<compile_context>
chip_gen: v5e
topology: v5e:2x2
jax: 0.10.0
libtpu: 0.0.40
codegen_flags: <defaults>
</compile_context>

<pallas_src>
import functools

import jax
import jax.numpy as jnp
from jax import lax
from jax.experimental import pallas as pl
from jax.experimental.pallas import tpu as pltpu


def cross_attention_kernel(q_ref, kv_ref, pos_ref,
                           wq_ref, wk_ref, wv_ref, wp_ref, bp_ref,
                           o_ref, *, num_heads, scale):
    B, Lq, C = q_ref.shape
    Lkv = kv_ref.shape[1]
    H = num_heads
    D = C // H

    q = q_ref[...]        # (B, Lq,  C)
    kv = kv_ref[...]      # (B, Lkv, C)
    pos = pos_ref[...]    # (B, Lq,  C)

    # q + pos ; kv + cat([pos, pos, pos], seq) via broadcast-add over the
    # (B, 3, Lq, C) view of kv (all reshapes split/merge at sublane-tile
    # multiples of 8 for f32, so they are layout-clean).
    q_in = (q + pos).reshape(B * Lq, C)                                    # (B*Lq,  C)
    k_in = (kv.reshape(B, 3, Lq, C) + pos[:, None, :, :]).reshape(B * Lkv, C)
    v_in = kv.reshape(B * Lkv, C)                                          # (B*Lkv, C)

    # Head-batched projections: (H, L, C) @ (H, C, D) -> (H, L, D).
    bmm_proj = (((2,), (1,)), ((0,), (0,)))

    def proj(x2d, w_ref):
        L = x2d.shape[0]
        xb = jnp.broadcast_to(x2d, (H, L, C))
        return lax.dot_general(xb, w_ref[...], bmm_proj,
                               preferred_element_type=jnp.float32)

    qp = proj(q_in, wq_ref)      # (H, B*Lq,  D)
    kp = proj(k_in, wk_ref)      # (H, B*Lkv, D)
    vp = proj(v_in, wv_ref)      # (H, B*Lkv, D)

    # Fold (H, B) into one leading batch dim G = H*B (leading-dim reshapes only).
    qh = qp.reshape(H * B, Lq, D)
    kh = kp.reshape(H * B, Lkv, D)
    vh = vp.reshape(H * B, Lkv, D)

    # Scores: (G, Lq, D) x (G, Lkv, D) -> (G, Lq, Lkv), then scale.
    attn = lax.dot_general(qh, kh, (((2,), (2,)), ((0,), (0,))),
                           preferred_element_type=jnp.float32) * scale

    # Softmax over the key axis — one fused max/exp/sum chain for all heads+batches.
    attn = attn - jnp.max(attn, axis=-1, keepdims=True)
    attn = jnp.exp(attn)
    # Exact reciprocal: approx=True (EUP vrcp) is nearly free but its ~1e-4
    # relative error does not reliably meet the 1e-4 check in __main__.
    attn = attn * pl.reciprocal(jnp.sum(attn, axis=-1, keepdims=True))
    # attn_drop is identity (p = 0.0 / eval mode).

    # P @ V: (G, Lq, Lkv) x (G, Lkv, D) -> (G, Lq, D).
    x = lax.dot_general(attn, vh, (((2,), (1,)), ((0,), (0,))),
                        preferred_element_type=jnp.float32)

    # Head merge fused with the output projection:
    #   concat_h(x_h) @ Wp == sum_h (x_h @ Wp[h*D:(h+1)*D, :])
    xh = x.reshape(H, B * Lq, D)                                           # (H, B*Lq, D)
    out_h = lax.dot_general(xh, wp_ref[...], (((2,), (1,)), ((0,), (0,))),
                            preferred_element_type=jnp.float32)            # (H, B*Lq, C)
    out = jnp.sum(out_h, axis=0) + bp_ref[...]                             # (B*Lq, C)
    # proj_drop is identity.
    o_ref[...] = out.reshape(B, Lq, C).astype(o_ref.dtype)


def cross_attention(q, kv, attn_pos_x, w_q, w_k, w_v, w_proj, b_proj,
                    *, num_heads):
    B, Lq, C = q.shape
    Lkv = kv.shape[1]
    assert Lkv == 3 * Lq, "CrossAttention.forward requires L_kv == 3 * L_q"
    assert C % num_heads == 0
    H = num_heads
    D = C // H
    scale = D ** (-0.5)

    # Trace-time weight re-layout (free at run time):
    #   PyTorch (out, in) -> per-head (in, out):
    #     wX_h[h, c, d] = W_X[h*D + d, c]       (q/k/v projections)
    #     wp_h[h, d, c] = W_proj[c, h*D + d]    (output projection)
    wq_h = jnp.transpose(w_q.T.reshape(C, H, D), (1, 0, 2))   # (H, C, D)
    wk_h = jnp.transpose(w_k.T.reshape(C, H, D), (1, 0, 2))   # (H, C, D)
    wv_h = jnp.transpose(w_v.T.reshape(C, H, D), (1, 0, 2))   # (H, C, D)
    wp_h = w_proj.T.reshape(H, D, C)                          # (H, D, C)
    b2d = b_proj.reshape(1, C)

    kernel = functools.partial(cross_attention_kernel,
                               num_heads=H, scale=scale)

    return pl.pallas_call(
        kernel,
        out_shape=jax.ShapeDtypeStruct((B, Lq, C), q.dtype),
        grid_spec=pltpu.PrefetchScalarGridSpec(
            num_scalar_prefetch=0,
            grid=(1,),  # whole problem in one invocation (no per-batch grid steps)
            in_specs=[
                pl.BlockSpec((B, Lq, C), lambda i: (0, 0, 0)),    # q
                pl.BlockSpec((B, Lkv, C), lambda i: (0, 0, 0)),   # kv
                pl.BlockSpec((B, Lq, C), lambda i: (0, 0, 0)),    # attn_pos_x
                pl.BlockSpec((H, C, D), lambda i: (0, 0, 0)),     # W_q (head-major)
                pl.BlockSpec((H, C, D), lambda i: (0, 0, 0)),     # W_k (head-major)
                pl.BlockSpec((H, C, D), lambda i: (0, 0, 0)),     # W_v (head-major)
                pl.BlockSpec((H, D, C), lambda i: (0, 0, 0)),     # W_proj (head-major)
                pl.BlockSpec((1, C), lambda i: (0, 0)),           # b_proj
            ],
            out_specs=pl.BlockSpec((B, Lq, C), lambda i: (0, 0, 0)),
        ),
        compiler_params=pltpu.CompilerParams(
            dimension_semantics=("arbitrary",)),
    )(q, kv, attn_pos_x, wq_h, wk_h, wv_h, wp_h, b2d)


def cross_attention_ref(q, kv, attn_pos_x, w_q, w_k, w_v, w_proj, b_proj,
                        *, num_heads):
    """Pure-JAX reference mirroring the PyTorch forward."""
    B, Lq, C = q.shape
    Lkv = kv.shape[1]
    H = num_heads
    D = C // H
    scale = D ** (-0.5)

    pos1 = jnp.concatenate([attn_pos_x] * 3, axis=1)          # (B, 3*Lq, C)
    qi = q + attn_pos_x
    ki = kv + pos1

    qp = (qi @ w_q.T).reshape(B, Lq, H, D).transpose(0, 2, 1, 3)
    kp = (ki @ w_k.T).reshape(B, Lkv, H, D).transpose(0, 2, 1, 3)
    vp = (kv @ w_v.T).reshape(B, Lkv, H, D).transpose(0, 2, 1, 3)

    attn = jnp.einsum("bhqd,bhkd->bhqk", qp, kp) * scale
    attn = jax.nn.softmax(attn, axis=-1)
    x = jnp.einsum("bhqk,bhkd->bhqd", attn, vp)
    x = x.transpose(0, 2, 1, 3).reshape(B, Lq, C)
    return x @ w_proj.T + b_proj


if __name__ == "__main__":
    B, Lq, C, H = 2, 8, 32, 8
    Lkv = 3 * Lq

    key = jax.random.PRNGKey(0)
    keys = jax.random.split(key, 8)

    q = jax.random.normal(keys[0], (B, Lq, C), jnp.float32)
    kv = jax.random.normal(keys[1], (B, Lkv, C), jnp.float32)
    attn_pos_x = jax.random.normal(keys[2], (B, Lq, C), jnp.float32)

    # Deterministic parameter init (PyTorch-Linear-like uniform(-1/sqrt(in), 1/sqrt(in))).
    bound = 1.0 / (C ** 0.5)
    w_q = jax.random.uniform(keys[3], (C, C), jnp.float32, -bound, bound)
    w_k = jax.random.uniform(keys[4], (C, C), jnp.float32, -bound, bound)
    w_v = jax.random.uniform(keys[5], (C, C), jnp.float32, -bound, bound)
    w_proj = jax.random.uniform(keys[6], (C, C), jnp.float32, -bound, bound)
    b_proj = jax.random.uniform(keys[7], (C,), jnp.float32, -bound, bound)

    out = cross_attention(q, kv, attn_pos_x, w_q, w_k, w_v, w_proj, b_proj,
                          num_heads=H)
    out = jax.block_until_ready(out)

    ref = cross_attention_ref(q, kv, attn_pos_x, w_q, w_k, w_v, w_proj, b_proj,
                              num_heads=H)
    assert out.shape == (B, Lq, C)
    assert jnp.allclose(out, ref, atol=1e-4, rtol=1e-4), "mismatch vs reference"

    print("KERNEL_OK")
</pallas_src>

<mosaic_0001>
module attributes {stable_mosaic.version = 11 : i64} {
  func.func @cross_attention_kernel(%arg0: i32, %arg1: memref<2x8x32xf32, #tpu.memory_space<vmem>>, %arg2: memref<2x24x32xf32, #tpu.memory_space<vmem>>, %arg3: memref<2x8x32xf32, #tpu.memory_space<vmem>>, %arg4: memref<8x32x4xf32, #tpu.memory_space<vmem>>, %arg5: memref<8x32x4xf32, #tpu.memory_space<vmem>>, %arg6: memref<8x32x4xf32, #tpu.memory_space<vmem>>, %arg7: memref<8x4x32xf32, #tpu.memory_space<vmem>>, %arg8: memref<1x32xf32, #tpu.memory_space<vmem>>, %arg9: memref<2x8x32xf32, #tpu.memory_space<vmem>>) attributes {dimension_semantics = [#tpu.dimension_semantics<arbitrary>], iteration_bounds = array<i64: 1>, scalar_prefetch = 0 : i64, scratch_operands = 0 : i64, tpu.core_type = #tpu.core_type<tc>, window_params = [{pipeline_mode = #tpu.pipeline_mode<synchronous>, transform_indices = @transform_0, window_bounds = array<i64: 2, 8, 32>}, {pipeline_mode = #tpu.pipeline_mode<synchronous>, transform_indices = @transform_1, window_bounds = array<i64: 2, 24, 32>}, {pipeline_mode = #tpu.pipeline_mode<synchronous>, transform_indices = @transform_2, window_bounds = array<i64: 2, 8, 32>}, {pipeline_mode = #tpu.pipeline_mode<synchronous>, transform_indices = @transform_3, window_bounds = array<i64: 8, 32, 4>}, {pipeline_mode = #tpu.pipeline_mode<synchronous>, transform_indices = @transform_4, window_bounds = array<i64: 8, 32, 4>}, {pipeline_mode = #tpu.pipeline_mode<synchronous>, transform_indices = @transform_5, window_bounds = array<i64: 8, 32, 4>}, {pipeline_mode = #tpu.pipeline_mode<synchronous>, transform_indices = @transform_6, window_bounds = array<i64: 8, 4, 32>}, {pipeline_mode = #tpu.pipeline_mode<synchronous>, transform_indices = @transform_7, window_bounds = array<i64: 1, 32>}, {pipeline_mode = #tpu.pipeline_mode<synchronous>, transform_indices = @transform_8, window_bounds = array<i64: 2, 8, 32>}]} {
    %c0 = arith.constant 0 : index
    %c0_0 = arith.constant 0 : index
    %c0_1 = arith.constant 0 : index
    %0 = vector.load %arg1[%c0, %c0_0, %c0_1] : memref<2x8x32xf32, #tpu.memory_space<vmem>>, vector<2x8x32xf32>
    %c0_2 = arith.constant 0 : index
    %c0_3 = arith.constant 0 : index
    %c0_4 = arith.constant 0 : index
    %1 = vector.load %arg2[%c0_2, %c0_3, %c0_4] : memref<2x24x32xf32, #tpu.memory_space<vmem>>, vector<2x24x32xf32>
    %c0_5 = arith.constant 0 : index
    %c0_6 = arith.constant 0 : index
    %c0_7 = arith.constant 0 : index
    %2 = vector.load %arg3[%c0_5, %c0_6, %c0_7] : memref<2x8x32xf32, #tpu.memory_space<vmem>>, vector<2x8x32xf32>
    %3 = arith.addf %0, %2 : vector<2x8x32xf32>
    %4 = vector.shape_cast %3 : vector<2x8x32xf32> to vector<16x32xf32>
    %5 = vector.shape_cast %1 : vector<2x24x32xf32> to vector<2x3x8x32xf32>
    %6 = vector.shape_cast %2 : vector<2x8x32xf32> to vector<2x1x8x32xf32>
    %7 = vector.broadcast %6 : vector<2x1x8x32xf32> to vector<2x3x8x32xf32>
    %8 = arith.addf %5, %7 : vector<2x3x8x32xf32>
    %9 = vector.shape_cast %8 : vector<2x3x8x32xf32> to vector<48x32xf32>
    %10 = vector.shape_cast %1 : vector<2x24x32xf32> to vector<48x32xf32>
    %11 = vector.shape_cast %4 : vector<16x32xf32> to vector<1x16x32xf32>
    %12 = vector.broadcast %11 : vector<1x16x32xf32> to vector<8x16x32xf32>
    %c0_8 = arith.constant 0 : index
    %c0_9 = arith.constant 0 : index
    %c0_10 = arith.constant 0 : index
    %13 = vector.load %arg4[%c0_8, %c0_9, %c0_10] : memref<8x32x4xf32, #tpu.memory_space<vmem>>, vector<8x32x4xf32>
    %cst = arith.constant dense<0.000000e+00> : vector<8x16x4xf32>
    %14 = tpu.matmul %12, %13, %cst {dimension_numbers = #tpu.dot_dimension_numbers<[2], [1], [1], [2], [0, 0, 0, 1, 1, 2], [0], [0]>} : vector<8x16x32xf32>, vector<8x32x4xf32>, vector<8x16x4xf32> -> vector<8x16x4xf32>
    %15 = vector.shape_cast %9 : vector<48x32xf32> to vector<1x48x32xf32>
    %16 = vector.broadcast %15 : vector<1x48x32xf32> to vector<8x48x32xf32>
    %c0_11 = arith.constant 0 : index
    %c0_12 = arith.constant 0 : index
    %c0_13 = arith.constant 0 : index
    %17 = vector.load %arg5[%c0_11, %c0_12, %c0_13] : memref<8x32x4xf32, #tpu.memory_space<vmem>>, vector<8x32x4xf32>
    %cst_14 = arith.constant dense<0.000000e+00> : vector<8x48x4xf32>
    %18 = tpu.matmul %16, %17, %cst_14 {dimension_numbers = #tpu.dot_dimension_numbers<[2], [1], [1], [2], [0, 0, 0, 1, 1, 2], [0], [0]>} : vector<8x48x32xf32>, vector<8x32x4xf32>, vector<8x48x4xf32> -> vector<8x48x4xf32>
    %19 = vector.shape_cast %10 : vector<48x32xf32> to vector<1x48x32xf32>
    %20 = vector.broadcast %19 : vector<1x48x32xf32> to vector<8x48x32xf32>
    %c0_15 = arith.constant 0 : index
    %c0_16 = arith.constant 0 : index
    %c0_17 = arith.constant 0 : index
    %21 = vector.load %arg6[%c0_15, %c0_16, %c0_17] : memref<8x32x4xf32, #tpu.memory_space<vmem>>, vector<8x32x4xf32>
    %cst_18 = arith.constant dense<0.000000e+00> : vector<8x48x4xf32>
    %22 = tpu.matmul %20, %21, %cst_18 {dimension_numbers = #tpu.dot_dimension_numbers<[2], [1], [1], [2], [0, 0, 0, 1, 1, 2], [0], [0]>} : vector<8x48x32xf32>, vector<8x32x4xf32>, vector<8x48x4xf32> -> vector<8x48x4xf32>
    %23 = vector.shape_cast %14 : vector<8x16x4xf32> to vector<16x8x4xf32>
    %24 = vector.shape_cast %18 : vector<8x48x4xf32> to vector<16x24x4xf32>
    %25 = vector.shape_cast %22 : vector<8x48x4xf32> to vector<16x24x4xf32>
    %cst_19 = arith.constant dense<0.000000e+00> : vector<16x8x24xf32>
    %26 = tpu.matmul %23, %24, %cst_19 {dimension_numbers = #tpu.dot_dimension_numbers<[2], [2], [1], [1], [0, 0, 0, 1, 1, 1], [0], [0]>} : vector<16x8x4xf32>, vector<16x24x4xf32>, vector<16x8x24xf32> -> vector<16x8x24xf32>
    %cst_20 = arith.constant 5.000000e-01 : f32
    %27 = vector.broadcast %cst_20 : f32 to vector<16x8x24xf32>
    %28 = arith.mulf %26, %27 : vector<16x8x24xf32>
    %cst_21 = arith.constant dense<0xFF800000> : vector<16x8xf32>
    %29 = vector.multi_reduction <maximumf>, %28, %cst_21 [2] : vector<16x8x24xf32> to vector<16x8xf32>
    %30 = vector.shape_cast %29 : vector<16x8xf32> to vector<16x8x1xf32>
    %31 = vector.broadcast %30 : vector<16x8x1xf32> to vector<16x8x24xf32>
    %32 = arith.subf %28, %31 : vector<16x8x24xf32>
    %33 = math.exp %32 : vector<16x8x24xf32>
    %cst_22 = arith.constant dense<0.000000e+00> : vector<16x8xf32>
    %34 = vector.multi_reduction <add>, %33, %cst_22 [2] : vector<16x8x24xf32> to vector<16x8xf32>
    %35 = vector.shape_cast %34 : vector<16x8xf32> to vector<16x8x1xf32>
    %36 = tpu.reciprocal %35 : vector<16x8x1xf32> -> vector<16x8x1xf32>
    %37 = vector.broadcast %36 : vector<16x8x1xf32> to vector<16x8x24xf32>
    %38 = arith.mulf %33, %37 : vector<16x8x24xf32>
    %cst_23 = arith.constant dense<0.000000e+00> : vector<16x8x4xf32>
    %39 = tpu.matmul %38, %25, %cst_23 {dimension_numbers = #tpu.dot_dimension_numbers<[2], [1], [1], [2], [0, 0, 0, 1, 1, 2], [0], [0]>} : vector<16x8x24xf32>, vector<16x24x4xf32>, vector<16x8x4xf32> -> vector<16x8x4xf32>
    %40 = vector.shape_cast %39 : vector<16x8x4xf32> to vector<8x16x4xf32>
    %c0_24 = arith.constant 0 : index
    %c0_25 = arith.constant 0 : index
    %c0_26 = arith.constant 0 : index
    %41 = vector.load %arg7[%c0_24, %c0_25, %c0_26] : memref<8x4x32xf32, #tpu.memory_space<vmem>>, vector<8x4x32xf32>
    %cst_27 = arith.constant dense<0.000000e+00> : vector<8x16x32xf32>
    %42 = tpu.matmul %40, %41, %cst_27 {dimension_numbers = #tpu.dot_dimension_numbers<[2], [1], [1], [2], [0, 0, 0, 1, 1, 2], [0], [0]>} : vector<8x16x4xf32>, vector<8x4x32xf32>, vector<8x16x32xf32> -> vector<8x16x32xf32>
    %cst_28 = arith.constant dense<0.000000e+00> : vector<16x32xf32>
    %43 = vector.multi_reduction <add>, %42, %cst_28 [0] : vector<8x16x32xf32> to vector<16x32xf32>
    %c0_29 = arith.constant 0 : index
    %c0_30 = arith.constant 0 : index
    %44 = vector.load %arg8[%c0_29, %c0_30] : memref<1x32xf32, #tpu.memory_space<vmem>>, vector<1x32xf32>
    %45 = vector.broadcast %44 : vector<1x32xf32> to vector<16x32xf32>
    %46 = arith.addf %43, %45 : vector<16x32xf32>
    %47 = vector.shape_cast %46 : vector<16x32xf32> to vector<2x8x32xf32>
    %c0_31 = arith.constant 0 : index
    %c0_32 = arith.constant 0 : index
    %c0_33 = arith.constant 0 : index
    %48 = vector.load %arg9[%c0_31, %c0_32, %c0_33] : memref<2x8x32xf32, #tpu.memory_space<vmem>>, vector<2x8x32xf32>
    tpu.vector_store %arg9[%c0_31, %c0_32, %c0_33], %47 {strides = array<i32>} : memref<2x8x32xf32, #tpu.memory_space<vmem>>, vector<2x8x32xf32>,
    return
  }
  func.func @transform_0(%arg0: i32) -> (i32, i32, i32) {
    %c0_i32 = arith.constant 0 : i32
    %c0_i32_0 = arith.constant 0 : i32
    %c0_i32_1 = arith.constant 0 : i32
    %c0_i32_2 = arith.constant 0 : i32
    return %c0_i32, %c0_i32_0, %c0_i32_1 : i32, i32, i32
  }
  func.func @transform_1(%arg0: i32) -> (i32, i32, i32) {
    %c0_i32 = arith.constant 0 : i32
    %c0_i32_0 = arith.constant 0 : i32
    %c0_i32_1 = arith.constant 0 : i32
    %c0_i32_2 = arith.constant 0 : i32
    return %c0_i32, %c0_i32_0, %c0_i32_1 : i32, i32, i32
  }
  func.func @transform_2(%arg0: i32) -> (i32, i32, i32) {
    %c0_i32 = arith.constant 0 : i32
    %c0_i32_0 = arith.constant 0 : i32
    %c0_i32_1 = arith.constant 0 : i32
    %c0_i32_2 = arith.constant 0 : i32
    return %c0_i32, %c0_i32_0, %c0_i32_1 : i32, i32, i32
  }
  func.func @transform_3(%arg0: i32) -> (i32, i32, i32) {
    %c0_i32 = arith.constant 0 : i32
    %c0_i32_0 = arith.constant 0 : i32
    %c0_i32_1 = arith.constant 0 : i32
    %c0_i32_2 = arith.constant 0 : i32
    return %c0_i32, %c0_i32_0, %c0_i32_1 : i32, i32, i32
  }
  func.func @transform_4(%arg0: i32) -> (i32, i32, i32) {
    %c0_i32 = arith.constant 0 : i32
    %c0_i32_0 = arith.constant 0 : i32
    %c0_i32_1 = arith.constant 0 : i32
    %c0_i32_2 = arith.constant 0 : i32
    return %c0_i32, %c0_i32_0, %c0_i32_1 : i32, i32, i32
  }
  func.func @transform_5(%arg0: i32) -> (i32, i32, i32) {
    %c0_i32 = arith.constant 0 : i32
    %c0_i32_0 = arith.constant 0 : i32
    %c0_i32_1 = arith.constant 0 : i32
    %c0_i32_2 = arith.constant 0 : i32
    return %c0_i32, %c0_i32_0, %c0_i32_1 : i32, i32, i32
  }
  func.func @transform_6(%arg0: i32) -> (i32, i32, i32) {
    %c0_i32 = arith.constant 0 : i32
    %c0_i32_0 = arith.constant 0 : i32
    %c0_i32_1 = arith.constant 0 : i32
    %c0_i32_2 = arith.constant 0 : i32
    return %c0_i32, %c0_i32_0, %c0_i32_1 : i32, i32, i32
  }
  func.func @transform_7(%arg0: i32) -> (i32, i32) {
    %c0_i32 = arith.constant 0 : i32
    %c0_i32_0 = arith.constant 0 : i32
    %c0_i32_1 = arith.constant 0 : i32
    return %c0_i32, %c0_i32_0 : i32, i32
  }
  func.func @transform_8(%arg0: i32) -> (i32, i32, i32) {
    %c0_i32 = arith.constant 0 : i32
    %c0_i32_0 = arith.constant 0 : i32
    %c0_i32_1 = arith.constant 0 : i32
    %c0_i32_2 = arith.constant 0 : i32
    return %c0_i32, %c0_i32_0, %c0_i32_1 : i32, i32, i32
  }
}

</mosaic_0001>

<bundles_post_ra>
// kernel: tpu_custom_call.1
= control target key start
LH: loop header
LB: loop body
LE: loop exit
PB: predicated region body
PF: predicated region fallthrough
CT: control target
= control target key end

     0   :  { %vm80_vm0 = vcmask 261120   ;;  %s4104_s0 = inlined_call_operand.vmem [shape: f32[2,8,32], index: 0, kind: input, shape index: {}]   ;;  %s4105_s1 = inlined_call_operand.vmem [shape: f32[2,24,32], index: 1, kind: input, shape index: {}]   ;;  %s4106_s2 = inlined_call_operand.vmem [shape: f32[2,8,32], index: 2, kind: input, shape index: {}]   ;;  %s4107_s3 = inlined_call_operand.vmem [shape: f32[8,32,4], index: 3, kind: input, shape index: {}]   ;;  %s4108_s4 = inlined_call_operand.vmem [shape: f32[8,32,4], index: 4, kind: input, shape index: {}]   ;;  %s4109_s5 = inlined_call_operand.vmem [shape: f32[8,32,4], index: 5, kind: input, shape index: {}]   ;;  %s4110_s6 = inlined_call_operand.vmem [shape: f32[8,4,32], index: 6, kind: input, shape index: {}]   ;;  %s4111_s7 = inlined_call_operand.vmem [shape: f32[1,32], index: 7, kind: input, shape index: {}]   ;;  %s4112_s8 = inlined_call_operand.hbm [shape: f32[2,8,32], index: 8, kind: output, shape index: {}]  }
   0x1   :  { %v51_v0 = vld [vmem:[%s4107_s3 + $0x18] sm:$0xff]  ;;  %v50_v4 = vld [vmem:[%s4107_s3 + $0x10] sm:$0xff]  ;;  %v49_v8 = vld [vmem:[%s4107_s3 + $0x8] sm:$0xff] }
   0x2   :  { %v55_v1 = vld [vmem:[%s4107_s3 + $0x38] sm:$0xff]  ;;  %99 = vmatpush.msra.mxu0 %v51_v0  ;;  %v54_v5 = vld [vmem:[%s4107_s3 + $0x30] sm:$0xff]  ;;  %v53_v9 = vld [vmem:[%s4107_s3 + $0x28] sm:$0xff] }
   0x3   :  { %v59_v2 = vld [vmem:[%s4107_s3 + $0x58] sm:$0xff]  ;;  %122 = vmatpush.msra.mxu1 %v55_v1  ;;  %v58_v6 = vld [vmem:[%s4107_s3 + $0x50] sm:$0xff]  ;;  %v57_v10 = vld [vmem:[%s4107_s3 + $0x48] sm:$0xff] }
   0x4   :  { %v63_v3 = vld [vmem:[%s4107_s3 + $0x78] sm:$0xff]  ;;  %145 = vmatpush.msra.mxu2 %v59_v2  ;;  %v62_v7 = vld [vmem:[%s4107_s3 + $0x70] sm:$0xff]  ;;  %100 = vmatpush.msra.mxu0 %v50_v4  ;;  %v61_v11 = vld [vmem:[%s4107_s3 + $0x68] sm:$0xff] }
   0x5   :  { %168 = vmatpush.msra.mxu3 %v63_v3  ;;  %123 = vmatpush.msra.mxu1 %v54_v5  ;;  %v48_v12 = vld [vmem:[%s4107_s3] sm:$0xff]  ;;  %v67_v19 = vld [vmem:[%s4107_s3 + $0x98] sm:$0xff]  ;;  %v31_v21 = vld [vmem:[%s4104_s0 + $0x8] sm:$0xff] }
   0x6   :  { %146 = vmatpush.msra.mxu2 %v58_v6  ;;  %v52_v13 = vld [vmem:[%s4107_s3 + $0x20] sm:$0xff]  ;;  %101 = vmatpush.msra.mxu0 %v49_v8  ;;  %v71_v20 = vld [vmem:[%s4107_s3 + $0xb8] sm:$0xff]  ;;  %v2977_v24 = vld [vmem:[%s4106_s2 + $0x8] sm:$0xff] }
   0x7   :  { %169 = vmatpush.msra.mxu3 %v62_v7  ;;  %v56_v14 = vld [vmem:[%s4107_s3 + $0x40] sm:$0xff]  ;;  %124 = vmatpush.msra.mxu1 %v53_v9  ;;  %v75_v22 = vld [vmem:[%s4107_s3 + $0xd8] sm:$0xff]  ;;  %v66_v25 = vld [vmem:[%s4107_s3 + $0x90] sm:$0xff]  ;;  %v2998_v31 = vadd.f32 %v2977_v24, %v31_v21 }
   0x8   :  { %v60_v15 = vld [vmem:[%s4107_s3 + $0x60] sm:$0xff]  ;;  %147 = vmatpush.msra.mxu2 %v57_v10  ;;  %102 = vmatpush.msra.mxu0 %v48_v12  ;;  %v79_v23 = vld [vmem:[%s4107_s3 + $0xf8] sm:$0xff]  ;;  %v70_v26 = vld [vmem:[%s4107_s3 + $0xb0] sm:$0xff] }
   0x9   :  { %v30_v16 = vld [vmem:[%s4104_s0] sm:$0xff]  ;;  %170 = vmatpush.msra.mxu3 %v61_v11  ;;  %125 = vmatpush.msra.mxu1 %v52_v13  ;;  %v74_v27 = vld [vmem:[%s4107_s3 + $0xd0] sm:$0xff]  ;;  %v65_v29 = vld [vmem:[%s4107_s3 + $0x88] sm:$0xff] }
   0xa   :  { %v2946_v17 = vld [vmem:[%s4106_s2] sm:$0xff]  ;;  %148 = vmatpush.msra.mxu2 %v56_v14  ;;  %191 = vmatpush.msrb.mxu0 %v67_v19  ;;  %v78_v28 = vld [vmem:[%s4107_s3 + $0xf0] sm:$0xff]  ;;  %v69_v30 = vld [vmem:[%s4107_s3 + $0xa8] sm:$0xff] }
   0xb   :  { %v2949_v18 = vadd.f32 %v2946_v17, %v30_v16  ;;  %171 = vmatpush.msra.mxu3 %v60_v15  ;;  %214 = vmatpush.msrb.mxu1 %v71_v20  ;;  %v73_v32 = vld [vmem:[%s4107_s3 + $0xc8] sm:$0xff]  ;;  %v64_v34 = vld [vmem:[%s4107_s3 + $0x80] sm:$0xff]  ;;  %v274_v38 = vld [vmem:[%s4108_s4 + $0x18] sm:$0xff] }
   0xc   :  { %237 = vmatpush.msrb.mxu2 %v75_v22  ;;  %192 = vmatpush.msrb.mxu0 %v66_v25  ;;  %v77_v33 = vld [vmem:[%s4107_s3 + $0xe8] sm:$0xff]  ;;  %v68_v35 = vld [vmem:[%s4107_s3 + $0xa0] sm:$0xff]  ;;  %v278_v39 = vld [vmem:[%s4108_s4 + $0x38] sm:$0xff] }
   0xd   :  { %2534 = vmatmul.msk.f32.vlgmr.msra.gmra.mxu0 %vm80_vm0, %v2949_v18  ;;  %2536 = vmatmul.msk.f32.vlgmr.msra.gmra.mxu1 %vm80_vm0, %v2949_v18  ;;  %v72_v36 = vld [vmem:[%s4107_s3 + $0xc0] sm:$0xff]  ;;  %v282_v40 = vld [vmem:[%s4108_s4 + $0x58] sm:$0xff] }
   0xe   :  { %2538 = vmatmul.msk.f32.vlgmr.msra.gmra.mxu2 %vm80_vm0, %v2949_v18  ;;  %2540 = vmatmul.msk.f32.vlgmr.msra.gmra.mxu3 %vm80_vm0, %v2949_v18  ;;  %v76_v37 = vld [vmem:[%s4107_s3 + $0xe0] sm:$0xff]  ;;  %v286_v41 = vld [vmem:[%s4108_s4 + $0x78] sm:$0xff] }
   0xf   :  { %260 = vmatpush.msrb.mxu3 %v79_v23  ;;  %215 = vmatpush.msrb.mxu1 %v70_v26 }
  0x10   :  { %238 = vmatpush.msrb.mxu2 %v74_v27  ;;  %193 = vmatpush.msrb.mxu0 %v65_v29 }
  0x11   :  { %261 = vmatpush.msrb.mxu3 %v78_v28  ;;  %216 = vmatpush.msrb.mxu1 %v69_v30 }
  0x12   :  { %239 = vmatpush.msrb.mxu2 %v73_v32  ;;  %194 = vmatpush.msrb.mxu0 %v64_v34 }
  0x13   :  { %262 = vmatpush.msrb.mxu3 %v77_v33  ;;  %217 = vmatpush.msrb.mxu1 %v68_v35 }
  0x15   :  { %2535 = vmatmul.msk.f32.gmra.mxu0 %vm80_vm0, %v2998_v31  ;;  %2537 = vmatmul.msk.f32.gmra.mxu1 %vm80_vm0, %v2998_v31 }
  0x16   :  { %2539 = vmatmul.msk.f32.gmra.mxu2 %vm80_vm0, %v2998_v31  ;;  %2541 = vmatmul.msk.f32.gmra.mxu3 %vm80_vm0, %v2998_v31 }
  0x17   :  { %13 = vsyncpa [#allocation3], 0  ;;  %240 = vmatpush.msrb.mxu2 %v72_v36  ;;  %263 = vmatpush.msrb.mxu3 %v76_v37  ;;  %v273_v42 = vld [vmem:[%s4108_s4 + $0x10] sm:$0xff]  ;;  %v272_v46 = vld [vmem:[%s4108_s4 + $0x8] sm:$0xff]  ;;  %vm931_vm1 = vcmask 31744   ;;  %vm1460_vm2 = vcmask 195584  }
  0x18   :  { %v277_v43 = vld [vmem:[%s4108_s4 + $0x30] sm:$0xff]  ;;  %333 = vmatpush.msra.mxu0 %v274_v38  ;;  %368 = vmatpush.msra.mxu1 %v278_v39  ;;  %v276_v47 = vld [vmem:[%s4108_s4 + $0x28] sm:$0xff]  ;;  %v271_v50 = vld [vmem:[%s4108_s4] sm:$0xff]  ;;  %s2844_s30 = smov [#allocation2]   ;;  %s2522_s10 = sshll.u32 %s4112_s8, 4  ;;  %s2523_s10 = int_to_ptr.hbm [resolvable:$true] %s2522_s10 }
  0x19   :  { %v281_v44 = vld [vmem:[%s4108_s4 + $0x50] sm:$0xff]  ;;  %403 = vmatpush.msra.mxu2 %v282_v40  ;;  %438 = vmatpush.msra.mxu3 %v286_v41  ;;  %v280_v48 = vld [vmem:[%s4108_s4 + $0x48] sm:$0xff]  ;;  %v275_v51 = vld [vmem:[%s4108_s4 + $0x20] sm:$0xff]  ;;  %s2520_s0 = sshll.u32 %s2844_s30, 4  ;;  %s2845_s11 = smov 128   ;;  %s2521_s0 = int_to_ptr.vmem [resolvable:$true] %s2520_s0 }
  0x1a   :  { %v285_v45 = vld [vmem:[%s4108_s4 + $0x70] sm:$0xff]  ;;  %334 = vmatpush.msra.mxu0 %v273_v42  ;;  %369 = vmatpush.msra.mxu1 %v277_v43  ;;  %v284_v49 = vld [vmem:[%s4108_s4 + $0x68] sm:$0xff]  ;;  %v279_v52 = vld [vmem:[%s4108_s4 + $0x40] sm:$0xff]  ;;  %s2846_s12 = smov 8  }
  0x1b   :  { %404 = vmatpush.msra.mxu2 %v281_v44  ;;  %439 = vmatpush.msra.mxu3 %v285_v45  ;;  %v283_v53 = vld [vmem:[%s4108_s4 + $0x60] sm:$0xff]  ;;  %v294_v54 = vld [vmem:[%s4108_s4 + $0xb8] sm:$0xff]  ;;  %v293_v58 = vld [vmem:[%s4108_s4 + $0xb0] sm:$0xff] }
  0x1c   :  { %335 = vmatpush.msra.mxu0 %v272_v46  ;;  %370 = vmatpush.msra.mxu1 %v276_v47  ;;  %v298_v55 = vld [vmem:[%s4108_s4 + $0xd8] sm:$0xff]  ;;  %v3098_v57 = vld [vmem:[%s4105_s1] sm:$0xff]  ;;  %v297_v59 = vld [vmem:[%s4108_s4 + $0xd0] sm:$0xff] }
  0x1d   :  { %2542 = vmatmul.msk.f32.vlgmr.msrb.gmra.mxu0 %vm80_vm0, %v2949_v18  ;;  %2544 = vmatmul.msk.f32.vlgmr.msrb.gmra.mxu1 %vm80_vm0, %v2949_v18  ;;  %v302_v56 = vld [vmem:[%s4108_s4 + $0xf8] sm:$0xff]  ;;  %v301_v61 = vld [vmem:[%s4108_s4 + $0xf0] sm:$0xff]  ;;  %v3118_v62 = vadd.f32 %v2946_v17, %v3098_v57  ;;  %v3127_v63 = vld [vmem:[%s4105_s1 + $0x8] sm:$0xff] }
  0x1e   :  { %2546 = vmatmul.msk.f32.vlgmr.msrb.gmra.mxu2 %vm80_vm0, %v2949_v18  ;;  %2548 = vmatmul.msk.f32.vlgmr.msrb.gmra.mxu3 %vm80_vm0, %v2949_v18  ;;  %v290_v60 = vld [vmem:[%s4108_s4 + $0x98] sm:$0xff]  ;;  %v292_v0 = vld [vmem:[%s4108_s4 + $0xa8] sm:$0xff]  ;;  %v289_v2 = vld [vmem:[%s4108_s4 + $0x90] sm:$0xff]  ;;  %v43_v3 = vadd.f32 %v2946_v17, %v3127_v63 }
  0x1f   :  { %405 = vmatpush.msra.mxu2 %v280_v48  ;;  %440 = vmatpush.msra.mxu3 %v284_v49  ;;  %v296_v1 = vld [vmem:[%s4108_s4 + $0xc8] sm:$0xff]  ;;  %v3149_v4 = vld [vmem:[%s4105_s1 + $0x10] sm:$0xff]  ;;  %v287_v7 = vld [vmem:[%s4108_s4 + $0x80] sm:$0xff] }
  0x20   :  { %336 = vmatpush.msra.mxu0 %v271_v50  ;;  %371 = vmatpush.msra.mxu1 %v275_v51  ;;  %v300_v5 = vld [vmem:[%s4108_s4 + $0xe8] sm:$0xff]  ;;  %v291_v8 = vld [vmem:[%s4108_s4 + $0xa0] sm:$0xff]  ;;  %v3173_v11 = vadd.f32 %v2946_v17, %v3149_v4  ;;  %v3186_v12 = vld [vmem:[%s4105_s1 + $0x18] sm:$0xff] }
  0x21   :  { %406 = vmatpush.msra.mxu2 %v279_v52  ;;  %441 = vmatpush.msra.mxu3 %v283_v53  ;;  %v288_v6 = vld [vmem:[%s4108_s4 + $0x88] sm:$0xff]  ;;  %v295_v9 = vld [vmem:[%s4108_s4 + $0xc0] sm:$0xff]  ;;  %v3190_v13 = vadd.f32 %v2977_v24, %v3186_v12  ;;  %v612_v15 = vld [vmem:[%s4109_s5 + $0x58] sm:$0xff] }
  0x22   :  { %508 = vmatpush.msrb.mxu1 %v294_v54  ;;  %473 = vmatpush.msrb.mxu0 %v290_v60  ;;  %v299_v10 = vld [vmem:[%s4108_s4 + $0xe0] sm:$0xff]  ;;  %v3217_v17 = vld [vmem:[%s4105_s1 + $0x28] sm:$0xff]  ;;  %v616_v18 = vld [vmem:[%s4109_s5 + $0x78] sm:$0xff] }
  0x23   :  { %543 = vmatpush.msrb.mxu2 %v298_v55  ;;  %578 = vmatpush.msrb.mxu3 %v302_v56  ;;  %v3203_v14 = vld [vmem:[%s4105_s1 + $0x20] sm:$0xff]  ;;  %v47_v19 = vadd.f32 %v2977_v24, %v3217_v17  ;;  %v611_v20 = vld [vmem:[%s4109_s5 + $0x50] sm:$0xff]  ;;  %v604_v21 = vld [vmem:[%s4109_s5 + $0x18] sm:$0xff] }
  0x24   :  { %509 = vmatpush.msrb.mxu1 %v293_v58  ;;  %474 = vmatpush.msrb.mxu0 %v289_v2  ;;  %v46_v16 = vadd.f32 %v2977_v24, %v3203_v14  ;;  %v608_v22 = vld [vmem:[%s4109_s5 + $0x38] sm:$0xff]  ;;  %v615_v23 = vld [vmem:[%s4109_s5 + $0x70] sm:$0xff]  ;;  %v610_v24 = vld [vmem:[%s4109_s5 + $0x48] sm:$0xff] }
  0x25   :  { %2543 = vmatmul.msk.f32.gmra.mxu0 %vm80_vm0, %v2998_v31  ;;  %2545 = vmatmul.msk.f32.gmra.mxu1 %vm80_vm0, %v2998_v31  ;;  %v603_v25 = vld [vmem:[%s4109_s5 + $0x10] sm:$0xff]  ;;  %v602_v27 = vld [vmem:[%s4109_s5 + $0x8] sm:$0xff]  ;;  %v609_v30 = vld [vmem:[%s4109_s5 + $0x40] sm:$0xff] }
  0x26   :  { %2547 = vmatmul.msk.f32.gmra.mxu2 %vm80_vm0, %v2998_v31  ;;  %2549 = vmatmul.msk.f32.gmra.mxu3 %vm80_vm0, %v2998_v31  ;;  %v607_v26 = vld [vmem:[%s4109_s5 + $0x30] sm:$0xff]  ;;  %v606_v28 = vld [vmem:[%s4109_s5 + $0x28] sm:$0xff]  ;;  %v601_v31 = vld [vmem:[%s4109_s5] sm:$0xff] }
  0x27   :  { %544 = vmatpush.msrb.mxu2 %v297_v59  ;;  %579 = vmatpush.msrb.mxu3 %v301_v61  ;;  %v614_v29 = vld [vmem:[%s4109_s5 + $0x68] sm:$0xff]  ;;  %v605_v32 = vld [vmem:[%s4109_s5 + $0x20] sm:$0xff]  ;;  %v628_v34 = vld [vmem:[%s4109_s5 + $0xd8] sm:$0xff] }
  0x28   :  { %510 = vmatpush.msrb.mxu1 %v292_v0  ;;  %475 = vmatpush.msrb.mxu0 %v288_v6  ;;  %v613_v33 = vld [vmem:[%s4109_s5 + $0x60] sm:$0xff]  ;;  %v632_v35 = vld [vmem:[%s4109_s5 + $0xf8] sm:$0xff]  ;;  %v627_v36 = vld [vmem:[%s4109_s5 + $0xd0] sm:$0xff] }
  0x29   :  { %545 = vmatpush.msrb.mxu2 %v296_v1  ;;  %580 = vmatpush.msrb.mxu3 %v300_v5  ;;  %v620_v37 = vld [vmem:[%s4109_s5 + $0x98] sm:$0xff]  ;;  %v631_v41 = vld [vmem:[%s4109_s5 + $0xf0] sm:$0xff]  ;;  %v626_v46 = vld [vmem:[%s4109_s5 + $0xc8] sm:$0xff] }
  0x2a   :  { %511 = vmatpush.msrb.mxu1 %v291_v8  ;;  %476 = vmatpush.msrb.mxu0 %v287_v7  ;;  %v624_v40 = vld [vmem:[%s4109_s5 + $0xb8] sm:$0xff]  ;;  %v619_v47 = vld [vmem:[%s4109_s5 + $0x90] sm:$0xff]  ;;  %v618_v48 = vld [vmem:[%s4109_s5 + $0x88] sm:$0xff] }
  0x2b   :  { %546 = vmatpush.msrb.mxu2 %v295_v9  ;;  %581 = vmatpush.msrb.mxu3 %v299_v10  ;;  %v623_v49 = vld [vmem:[%s4109_s5 + $0xb0] sm:$0xff]  ;;  %v617_v54 = vld [vmem:[%s4109_s5 + $0x80] sm:$0xff]  ;;  %v622_v55 = vld [vmem:[%s4109_s5 + $0xa8] sm:$0xff] }
  0x2c   :  { %v625_v56 = vld [vmem:[%s4109_s5 + $0xc0] sm:$0xff]  ;;  %v630_v58 = vld [vmem:[%s4109_s5 + $0xe8] sm:$0xff] }
  0x2d   :  { %2550 = vmatmul.msk.f32.vlgmr.msra.gmra.mxu0 %vm80_vm0, %v3118_v62  ;;  %2556 = vmatmul.msk.f32.vlgmr.msra.gmra.mxu1 %vm80_vm0, %v3118_v62  ;;  %v621_v59 = vld [vmem:[%s4109_s5 + $0xa0] sm:$0xff] }
  0x2e   :  { %2562 = vmatmul.msk.f32.vlgmr.msra.gmra.mxu2 %vm80_vm0, %v3118_v62  ;;  %2568 = vmatmul.msk.f32.vlgmr.msra.gmra.mxu3 %vm80_vm0, %v3118_v62  ;;  %v629_v60 = vld [vmem:[%s4109_s5 + $0xe0] sm:$0xff] }
  0x2f   :  { %733 = vmatpush.msra.mxu2 %v612_v15  ;;  %768 = vmatpush.msra.mxu3 %v616_v18 }
  0x30   :  { %663 = vmatpush.msra.mxu0 %v604_v21  ;;  %698 = vmatpush.msra.mxu1 %v608_v22 }
  0x31   :  { %734 = vmatpush.msra.mxu2 %v611_v20  ;;  %769 = vmatpush.msra.mxu3 %v615_v23 }
  0x32   :  { %664 = vmatpush.msra.mxu0 %v603_v25  ;;  %699 = vmatpush.msra.mxu1 %v607_v26 }
  0x33   :  { %735 = vmatpush.msra.mxu2 %v610_v24  ;;  %770 = vmatpush.msra.mxu3 %v614_v29 }
  0x34   :  { %665 = vmatpush.msra.mxu0 %v602_v27  ;;  %700 = vmatpush.msra.mxu1 %v606_v28 }
  0x35   :  { %2551 = vmatmul.msk.f32.gmra.mxu0 %vm80_vm0, %v43_v3  ;;  %2557 = vmatmul.msk.f32.gmra.mxu1 %vm80_vm0, %v43_v3 }
  0x36   :  { %2563 = vmatmul.msk.f32.gmra.mxu2 %vm80_vm0, %v43_v3  ;;  %2569 = vmatmul.msk.f32.gmra.mxu3 %vm80_vm0, %v43_v3 }
  0x37   :  { %736 = vmatpush.msra.mxu2 %v609_v30  ;;  %666 = vmatpush.msra.mxu0 %v601_v31 }
  0x38   :  { %701 = vmatpush.msra.mxu1 %v605_v32  ;;  %771 = vmatpush.msra.mxu3 %v613_v33 }
  0x3d   :  { %2552 = vmatmul.msk.f32.gmra.mxu0 %vm80_vm0, %v3173_v11  ;;  %2558 = vmatmul.msk.f32.gmra.mxu1 %vm80_vm0, %v3173_v11 }
  0x3e   :  { %2564 = vmatmul.msk.f32.gmra.mxu2 %vm80_vm0, %v3173_v11  ;;  %2570 = vmatmul.msk.f32.gmra.mxu3 %vm80_vm0, %v3173_v11 }
  0x45   :  { %2553 = vmatmul.msk.f32.gmra.mxu0 %vm80_vm0, %v3190_v13  ;;  %2559 = vmatmul.msk.f32.gmra.mxu1 %vm80_vm0, %v3190_v13 }
  0x46   :  { %2565 = vmatmul.msk.f32.gmra.mxu2 %vm80_vm0, %v3190_v13  ;;  %2571 = vmatmul.msk.f32.gmra.mxu3 %vm80_vm0, %v3190_v13 }
  0x4d   :  { %2554 = vmatmul.msk.f32.gmra.mxu0 %vm80_vm0, %v46_v16  ;;  %2560 = vmatmul.msk.f32.gmra.mxu1 %vm80_vm0, %v46_v16 }
  0x4e   :  { %2566 = vmatmul.msk.f32.gmra.mxu2 %vm80_vm0, %v46_v16  ;;  %2572 = vmatmul.msk.f32.gmra.mxu3 %vm80_vm0, %v46_v16 }
  0x55   :  { %2555 = vmatmul.msk.f32.gmra.mxu0 %vm80_vm0, %v47_v19  ;;  %2561 = vmatmul.msk.f32.gmra.mxu1 %vm80_vm0, %v47_v19 }
  0x56   :  { %2567 = vmatmul.msk.f32.gmra.mxu2 %vm80_vm0, %v47_v19  ;;  %2573 = vmatmul.msk.f32.gmra.mxu3 %vm80_vm0, %v47_v19 }
  0x5d   :  { %2574 = vmatmul.msk.f32.vlgmr.msrb.gmra.mxu0 %vm80_vm0, %v3118_v62  ;;  %2580 = vmatmul.msk.f32.vlgmr.msrb.gmra.mxu1 %vm80_vm0, %v3118_v62 }
  0x5e   :  { %2586 = vmatmul.msk.f32.vlgmr.msrb.gmra.mxu2 %vm80_vm0, %v3118_v62  ;;  %2592 = vmatmul.msk.f32.vlgmr.msrb.gmra.mxu3 %vm80_vm0, %v3118_v62 }
  0x5f   :  { %873 = vmatpush.msrb.mxu2 %v628_v34  ;;  %908 = vmatpush.msrb.mxu3 %v632_v35 }
  0x60   :  { %803 = vmatpush.msrb.mxu0 %v620_v37  ;;  %838 = vmatpush.msrb.mxu1 %v624_v40 }
  0x61   :  { %874 = vmatpush.msrb.mxu2 %v627_v36  ;;  %909 = vmatpush.msrb.mxu3 %v631_v41 }
  0x62   :  { %804 = vmatpush.msrb.mxu0 %v619_v47  ;;  %839 = vmatpush.msrb.mxu1 %v623_v49 }
  0x63   :  { %875 = vmatpush.msrb.mxu2 %v626_v46  ;;  %910 = vmatpush.msrb.mxu3 %v630_v58 }
  0x64   :  { %805 = vmatpush.msrb.mxu0 %v618_v48  ;;  %840 = vmatpush.msrb.mxu1 %v622_v55 }
  0x65   :  { %2575 = vmatmul.msk.f32.gmra.mxu0 %vm80_vm0, %v43_v3  ;;  %2581 = vmatmul.msk.f32.gmra.mxu1 %vm80_vm0, %v43_v3 }
  0x66   :  { %2587 = vmatmul.msk.f32.gmra.mxu2 %vm80_vm0, %v43_v3  ;;  %2593 = vmatmul.msk.f32.gmra.mxu3 %vm80_vm0, %v43_v3 }
  0x67   :  { %806 = vmatpush.msrb.mxu0 %v617_v54  ;;  %876 = vmatpush.msrb.mxu2 %v625_v56 }
  0x68   :  { %841 = vmatpush.msrb.mxu1 %v621_v59  ;;  %911 = vmatpush.msrb.mxu3 %v629_v60 }
  0x6d   :  { %2576 = vmatmul.msk.f32.gmra.mxu0 %vm80_vm0, %v3173_v11  ;;  %2582 = vmatmul.msk.f32.gmra.mxu1 %vm80_vm0, %v3173_v11 }
  0x6e   :  { %2588 = vmatmul.msk.f32.gmra.mxu2 %vm80_vm0, %v3173_v11  ;;  %2594 = vmatmul.msk.f32.gmra.mxu3 %vm80_vm0, %v3173_v11 }
  0x75   :  { %2577 = vmatmul.msk.f32.gmra.mxu0 %vm80_vm0, %v3190_v13  ;;  %2583 = vmatmul.msk.f32.gmra.mxu1 %vm80_vm0, %v3190_v13 }
  0x76   :  { %2589 = vmatmul.msk.f32.gmra.mxu2 %vm80_vm0, %v3190_v13  ;;  %2595 = vmatmul.msk.f32.gmra.mxu3 %vm80_vm0, %v3190_v13 }
  0x7d   :  { %2578 = vmatmul.msk.f32.gmra.mxu0 %vm80_vm0, %v46_v16  ;;  %2584 = vmatmul.msk.f32.gmra.mxu1 %vm80_vm0, %v46_v16 }
  0x7e   :  { %2590 = vmatmul.msk.f32.gmra.mxu2 %vm80_vm0, %v46_v16  ;;  %2596 = vmatmul.msk.f32.gmra.mxu3 %vm80_vm0, %v46_v16 }
  0x85   :  { %2579 = vmatmul.msk.f32.gmra.mxu0 %vm80_vm0, %v47_v19  ;;  %2585 = vmatmul.msk.f32.gmra.mxu1 %vm80_vm0, %v47_v19 }
  0x86   :  { %2591 = vmatmul.msk.f32.gmra.mxu2 %vm80_vm0, %v47_v19  ;;  %2597 = vmatmul.msk.f32.gmra.mxu3 %vm80_vm0, %v47_v19 }
  0x8a   :  { %v3318_v38 = vpop.f32.mrf.mxu0  ;;  %v3320_v39 = vpop.f32.mrf.mxu1 }
  0x8d   :  { %2598 = vmatmul.msk.f32.vlgmr.msra.gmra.mxu0 %vm80_vm0, %v3098_v57  ;;  %2604 = vmatmul.msk.f32.vlgmr.msra.gmra.mxu1 %vm80_vm0, %v3098_v57 }
  0x8e   :  { %2610 = vmatmul.msk.f32.vlgmr.msra.gmra.mxu2 %vm80_vm0, %v3098_v57  ;;  %2616 = vmatmul.msk.f32.vlgmr.msra.gmra.mxu3 %vm80_vm0, %v3098_v57 }
  0x91   :  { %v3336_v42 = vpop.f32.mrf.mxu2  ;;  %v3338_v43 = vpop.f32.mrf.mxu3 }
  0x92   :  { %v3340_v44 = vpop.f32.mrf.mxu0  ;;  %v3342_v45 = vpop.f32.mrf.mxu1 }
  0x95   :  { %2599 = vmatmul.msk.f32.gmra.mxu0 %vm80_vm0, %v3127_v63  ;;  %2605 = vmatmul.msk.f32.gmra.mxu1 %vm80_vm0, %v3127_v63 }
  0x96   :  { %2611 = vmatmul.msk.f32.gmra.mxu2 %vm80_vm0, %v3127_v63  ;;  %2617 = vmatmul.msk.f32.gmra.mxu3 %vm80_vm0, %v3127_v63 }
  0x99   :  { %v3364_v50 = vpop.f32.mrf.mxu2  ;;  %v3366_v51 = vpop.f32.mrf.mxu3 }
  0x9a   :  { %v3368_v52 = vpop.f32.mrf.mxu0  ;;  %v3370_v53 = vpop.f32.mrf.mxu1 }
  0x9d   :  { %2600 = vmatmul.msk.f32.gmra.mxu0 %vm80_vm0, %v3149_v4  ;;  %2606 = vmatmul.msk.f32.gmra.mxu1 %vm80_vm0, %v3149_v4 }
  0x9e   :  { %2612 = vmatmul.msk.f32.gmra.mxu2 %vm80_vm0, %v3149_v4  ;;  %2618 = vmatmul.msk.f32.gmra.mxu3 %vm80_vm0, %v3149_v4 }
  0xa1   :  { %v3398_v61 = vpop.f32.mrf.mxu2  ;;  %v3400_v62 = vpop.f32.mrf.mxu3 }
  0xa2   :  { %v3402_v0 = vpop.f32.mrf.mxu0  ;;  %v3404_v1 = vpop.f32.mrf.mxu1 }
  0xa5   :  { %2601 = vmatmul.msk.f32.gmra.mxu0 %vm80_vm0, %v3186_v12  ;;  %2607 = vmatmul.msk.f32.gmra.mxu1 %vm80_vm0, %v3186_v12 }
  0xa6   :  { %2613 = vmatmul.msk.f32.gmra.mxu2 %vm80_vm0, %v3186_v12  ;;  %2619 = vmatmul.msk.f32.gmra.mxu3 %vm80_vm0, %v3186_v12 }
  0xa9   :  { %v3414_v2 = vpop.f32.mrf.mxu2  ;;  %v3416_v3 = vpop.f32.mrf.mxu3 }
  0xaa   :  { %v338_v5 = vpop.f32.mrf.mxu0  ;;  %v373_v6 = vpop.f32.mrf.mxu1 }
  0xad   :  { %2602 = vmatmul.msk.f32.gmra.mxu0 %vm80_vm0, %v3203_v14  ;;  %2608 = vmatmul.msk.f32.gmra.mxu1 %vm80_vm0, %v3203_v14 }
  0xae   :  { %2614 = vmatmul.msk.f32.gmra.mxu2 %vm80_vm0, %v3203_v14  ;;  %2620 = vmatmul.msk.f32.gmra.mxu3 %vm80_vm0, %v3203_v14 }
  0xb1   :  { %v408_v7 = vpop.f32.mrf.mxu2  ;;  %v443_v8 = vpop.f32.mrf.mxu3 }
  0xb2   :  { %v341_v9 = vpop.f32.mrf.mxu0  ;;  %v376_v10 = vpop.f32.mrf.mxu1 }
  0xb5   :  { %2603 = vmatmul.msk.f32.gmra.mxu0 %vm80_vm0, %v3217_v17  ;;  %2609 = vmatmul.msk.f32.gmra.mxu1 %vm80_vm0, %v3217_v17 }
  0xb6   :  { %2615 = vmatmul.msk.f32.gmra.mxu2 %vm80_vm0, %v3217_v17  ;;  %2621 = vmatmul.msk.f32.gmra.mxu3 %vm80_vm0, %v3217_v17 }
  0xb9   :  { %v411_v11 = vpop.f32.mrf.mxu2  ;;  %v446_v13 = vpop.f32.mrf.mxu3 }
  0xba   :  { %v344_v15 = vpop.f32.mrf.mxu0  ;;  %v379_v16 = vpop.f32.mrf.mxu1 }
  0xbb   :  { %2646 = vmatpush.xpose.msk.msra.mxu0 %vm931_vm1, %v344_v15  ;;  %2654 = vmatpush.xpose.msk.msra.mxu2 %vm931_vm1, %v379_v16 }
  0xbd   :  { %2622 = vmatmul.msk.f32.vlgmr.msrb.gmra.mxu0 %vm80_vm0, %v3098_v57  ;;  %2628 = vmatmul.msk.f32.vlgmr.msrb.gmra.mxu1 %vm80_vm0, %v3098_v57 }
  0xbe   :  { %2634 = vmatmul.msk.f32.vlgmr.msrb.gmra.mxu2 %vm80_vm0, %v3098_v57  ;;  %2640 = vmatmul.msk.f32.vlgmr.msrb.gmra.mxu3 %vm80_vm0, %v3098_v57 }
  0xbf   :  { %2647 = vmatpush.xpose.msk.msra.mxu0 %vm931_vm1, %v341_v9  ;;  %2655 = vmatpush.xpose.msk.msra.mxu2 %vm931_vm1, %v376_v10 }
  0xc1   :  { %v414_v18 = vpop.f32.mrf.mxu2  ;;  %v449_v19 = vpop.f32.mrf.mxu3 }
  0xc2   :  { %v347_v20 = vpop.f32.mrf.mxu0  ;;  %v382_v21 = vpop.f32.mrf.mxu1 }
  0xc3   :  { %2648 = vmatpush.xpose.msk.msra.mxu0 %vm931_vm1, %v338_v5  ;;  %2656 = vmatpush.xpose.msk.msra.mxu2 %vm931_vm1, %v373_v6 }
  0xc5   :  { %2623 = vmatmul.msk.f32.gmra.mxu0 %vm80_vm0, %v3127_v63  ;;  %2629 = vmatmul.msk.f32.gmra.mxu1 %vm80_vm0, %v3127_v63 }
  0xc6   :  { %2635 = vmatmul.msk.f32.gmra.mxu2 %vm80_vm0, %v3127_v63  ;;  %2641 = vmatmul.msk.f32.gmra.mxu3 %vm80_vm0, %v3127_v63 }
  0xc7   :  { %2662 = vmatpush.xpose.msk.msrb.mxu0 %vm931_vm1, %v414_v18  ;;  %2670 = vmatpush.xpose.msk.msrb.mxu2 %vm931_vm1, %v449_v19 }
  0xc9   :  { %v417_v57 = vpop.f32.mrf.mxu2  ;;  %v452_v22 = vpop.f32.mrf.mxu3 }
  0xca   :  { %v350_v23 = vpop.f32.mrf.mxu0  ;;  %v385_v24 = vpop.f32.mrf.mxu1 }
  0xcb   :  { %2663 = vmatpush.xpose.msk.msrb.mxu0 %vm931_vm1, %v411_v11  ;;  %2671 = vmatpush.xpose.msk.msrb.mxu2 %vm931_vm1, %v446_v13 }
  0xcd   :  { %2624 = vmatmul.msk.f32.gmra.mxu0 %vm80_vm0, %v3149_v4  ;;  %2630 = vmatmul.msk.f32.gmra.mxu1 %vm80_vm0, %v3149_v4 }
  0xce   :  { %2636 = vmatmul.msk.f32.gmra.mxu2 %vm80_vm0, %v3149_v4  ;;  %2642 = vmatmul.msk.f32.gmra.mxu3 %vm80_vm0, %v3149_v4 }
  0xcf   :  { %2664 = vmatpush.xpose.msk.msrb.mxu0 %vm931_vm1, %v408_v7  ;;  %2672 = vmatpush.xpose.msk.msrb.mxu2 %vm931_vm1, %v443_v8 }
  0xd1   :  { %v420_v63 = vpop.f32.mrf.mxu2  ;;  %v455_v25 = vpop.f32.mrf.mxu3 }
  0xd2   :  { %v353_v26 = vpop.f32.mrf.mxu0  ;;  %v388_v27 = vpop.f32.mrf.mxu1 }
  0xd3   :  { %2650 = vmatpush.xpose.msk.msra.mxu1 %vm931_vm1, %v353_v26  ;;  %2658 = vmatpush.xpose.msk.msra.mxu3 %vm931_vm1, %v388_v27 }
  0xd5   :  { %2625 = vmatmul.msk.f32.gmra.mxu0 %vm80_vm0, %v3186_v12  ;;  %2631 = vmatmul.msk.f32.gmra.mxu1 %vm80_vm0, %v3186_v12 }
  0xd6   :  { %2637 = vmatmul.msk.f32.gmra.mxu2 %vm80_vm0, %v3186_v12  ;;  %2643 = vmatmul.msk.f32.gmra.mxu3 %vm80_vm0, %v3186_v12 }
  0xd7   :  { %2651 = vmatpush.xpose.msk.msra.mxu1 %vm931_vm1, %v350_v23  ;;  %2659 = vmatpush.xpose.msk.msra.mxu3 %vm931_vm1, %v385_v24 }
  0xd9   :  { %v423_v4 = vpop.f32.mrf.mxu2  ;;  %v458_v28 = vpop.f32.mrf.mxu3 }
  0xda   :  { %v478_v29 = vpop.f32.mrf.mxu0  ;;  %v513_v30 = vpop.f32.mrf.mxu1 }
  0xdb   :  { %2652 = vmatpush.xpose.msk.msra.mxu1 %vm931_vm1, %v347_v20  ;;  %2660 = vmatpush.xpose.msk.msra.mxu3 %vm931_vm1, %v382_v21 }
  0xdd   :  { %2626 = vmatmul.msk.f32.gmra.mxu0 %vm80_vm0, %v3203_v14  ;;  %2632 = vmatmul.msk.f32.gmra.mxu1 %vm80_vm0, %v3203_v14 }
  0xde   :  { %2638 = vmatmul.msk.f32.gmra.mxu2 %vm80_vm0, %v3203_v14  ;;  %2644 = vmatmul.msk.f32.gmra.mxu3 %vm80_vm0, %v3203_v14 }
  0xdf   :  { %2666 = vmatpush.xpose.msk.msrb.mxu1 %vm931_vm1, %v423_v4  ;;  %2674 = vmatpush.xpose.msk.msrb.mxu3 %vm931_vm1, %v458_v28 }
  0xe1   :  { %v548_v12 = vpop.f32.mrf.mxu2  ;;  %v583_v31 = vpop.f32.mrf.mxu3 }
  0xe2   :  { %v481_v32 = vpop.f32.mrf.mxu0  ;;  %v516_v33 = vpop.f32.mrf.mxu1 }
  0xe3   :  { %2667 = vmatpush.xpose.msk.msrb.mxu1 %vm931_vm1, %v420_v63  ;;  %2675 = vmatpush.xpose.msk.msrb.mxu3 %vm931_vm1, %v455_v25 }
  0xe5   :  { %2627 = vmatmul.msk.f32.gmra.mxu0 %vm80_vm0, %v3217_v17  ;;  %2633 = vmatmul.msk.f32.gmra.mxu1 %vm80_vm0, %v3217_v17 }
  0xe6   :  { %2639 = vmatmul.msk.f32.gmra.mxu2 %vm80_vm0, %v3217_v17  ;;  %2645 = vmatmul.msk.f32.gmra.mxu3 %vm80_vm0, %v3217_v17 }
  0xe7   :  { %2668 = vmatpush.xpose.msk.msrb.mxu1 %vm931_vm1, %v417_v57  ;;  %2676 = vmatpush.xpose.msk.msrb.mxu3 %vm931_vm1, %v452_v22 }
  0xe9   :  { %v551_v14 = vpop.f32.mrf.mxu2  ;;  %v586_v34 = vpop.f32.mrf.mxu3 }
  0xea   :  { %v484_v35 = vpop.f32.mrf.mxu0  ;;  %v519_v36 = vpop.f32.mrf.mxu1 }
  0xed   :  { %2649 = vmatmul.msk.f32.vlgmr.msra.gmra.mxu0 %vm931_vm1, %v3318_v38  ;;  %2653 = vmatmul.msk.f32.vlgmr.msra.gmra.mxu1 %vm931_vm1, %v3340_v44 }
  0xee   :  { %2657 = vmatmul.msk.f32.vlgmr.msra.gmra.mxu2 %vm931_vm1, %v3320_v39  ;;  %2661 = vmatmul.msk.f32.vlgmr.msra.gmra.mxu3 %vm931_vm1, %v3342_v45 }
  0xef   :  { %2678 = vmatpush.xpose.msk.msra.mxu0 %vm931_vm1, %v484_v35  ;;  %2686 = vmatpush.xpose.msk.msra.mxu2 %vm931_vm1, %v519_v36 }
  0xf1   :  { %v554_v17 = vpop.f32.mrf.mxu2  ;;  %v589_v37 = vpop.f32.mrf.mxu3 }
  0xf2   :  { %v487_v40 = vpop.f32.mrf.mxu0  ;;  %v522_v41 = vpop.f32.mrf.mxu1 }
  0xf3   :  { %2679 = vmatpush.xpose.msk.msra.mxu0 %vm931_vm1, %v481_v32  ;;  %2687 = vmatpush.xpose.msk.msra.mxu2 %vm931_vm1, %v516_v33 }
  0xf5   :  { %2665 = vmatmul.msk.f32.vlgmr.msrb.gmra.mxu0 %vm931_vm1, %v3336_v42  ;;  %2669 = vmatmul.msk.f32.vlgmr.msrb.gmra.mxu1 %vm931_vm1, %v3364_v50 }
  0xf6   :  { %2673 = vmatmul.msk.f32.vlgmr.msrb.gmra.mxu2 %vm931_vm1, %v3338_v43  ;;  %2677 = vmatmul.msk.f32.vlgmr.msrb.gmra.mxu3 %vm931_vm1, %v3366_v51 }
  0xf7   :  { %2680 = vmatpush.xpose.msk.msra.mxu0 %vm931_vm1, %v478_v29  ;;  %2688 = vmatpush.xpose.msk.msra.mxu2 %vm931_vm1, %v513_v30 }
  0xf9   :  { %v557_v38 = vpop.f32.mrf.mxu2  ;;  %v592_v39 = vpop.f32.mrf.mxu3 }
  0xfa   :  { %v490_v42 = vpop.f32.mrf.mxu0  ;;  %v525_v44 = vpop.f32.mrf.mxu1 }
  0xfb   :  { %2694 = vmatpush.xpose.msk.msrb.mxu0 %vm931_vm1, %v554_v17  ;;  %2702 = vmatpush.xpose.msk.msrb.mxu2 %vm931_vm1, %v589_v37 }
  0xfd   :  { %2681 = vmatmul.msk.f32.vlgmr.msra.gmra.mxu0 %vm931_vm1, %v3368_v52 }
  0xfe   :  { %2689 = vmatmul.msk.f32.vlgmr.msra.gmra.mxu2 %vm931_vm1, %v3370_v53 }
  0xff   :  { %2695 = vmatpush.xpose.msk.msrb.mxu0 %vm931_vm1, %v551_v14  ;;  %2703 = vmatpush.xpose.msk.msrb.mxu2 %vm931_vm1, %v586_v34 }
 0x101   :  { %v560_v43 = vpop.f32.mrf.mxu2  ;;  %v595_v45 = vpop.f32.mrf.mxu3 }
 0x102   :  { %v493_v46 = vpop.f32.mrf.mxu0  ;;  %v528_v47 = vpop.f32.mrf.mxu1 }
 0x103   :  { %2696 = vmatpush.xpose.msk.msrb.mxu0 %vm931_vm1, %v548_v12  ;;  %2704 = vmatpush.xpose.msk.msrb.mxu2 %vm931_vm1, %v583_v31 }
 0x104   :  { %2682 = vmatpush.xpose.msk.msra.mxu1 %vm931_vm1, %v493_v46  ;;  %2690 = vmatpush.xpose.msk.msra.mxu3 %vm931_vm1, %v528_v47 }
 0x106   :  { %2697 = vmatmul.msk.f32.vlgmr.msrb.gmra.mxu0 %vm931_vm1, %v3398_v61  ;;  %2705 = vmatmul.msk.f32.vlgmr.msrb.gmra.mxu2 %vm931_vm1, %v3400_v62 }
 0x108   :  { %2683 = vmatpush.xpose.msk.msra.mxu1 %vm931_vm1, %v490_v42  ;;  %2691 = vmatpush.xpose.msk.msra.mxu3 %vm931_vm1, %v525_v44 }
 0x109   :  { %v563_v48 = vpop.f32.mrf.mxu2  ;;  %v598_v49 = vpop.f32.mrf.mxu3 }
 0x10a   :  { %v668_v50 = vpop.f32.mrf.mxu0  ;;  %v703_v51 = vpop.f32.mrf.mxu1 }
 0x10c   :  { %2684 = vmatpush.xpose.msk.msra.mxu1 %vm931_vm1, %v487_v40  ;;  %2692 = vmatpush.xpose.msk.msra.mxu3 %vm931_vm1, %v522_v41 }
 0x10f   :  { %2685 = vmatmul.msk.f32.vlgmr.msra.gmra.mxu1 %vm931_vm1, %v3402_v0  ;;  %2693 = vmatmul.msk.f32.vlgmr.msra.gmra.mxu3 %vm931_vm1, %v3404_v1 }
 0x110   :  { %2698 = vmatpush.xpose.msk.msrb.mxu1 %vm931_vm1, %v563_v48  ;;  %2706 = vmatpush.xpose.msk.msrb.mxu3 %vm931_vm1, %v598_v49 }
 0x111   :  { %v738_v52 = vpop.f32.mrf.mxu2  ;;  %v773_v53 = vpop.f32.mrf.mxu3 }
 0x112   :  { %v671_v54 = vpop.f32.mrf.mxu0  ;;  %v706_v55 = vpop.f32.mrf.mxu1 }
 0x114   :  { %2699 = vmatpush.xpose.msk.msrb.mxu1 %vm931_vm1, %v560_v43  ;;  %2707 = vmatpush.xpose.msk.msrb.mxu3 %vm931_vm1, %v595_v45 }
 0x118   :  { %2700 = vmatpush.xpose.msk.msrb.mxu1 %vm931_vm1, %v557_v38  ;;  %2708 = vmatpush.xpose.msk.msrb.mxu3 %vm931_vm1, %v592_v39 }
 0x119   :  { %v741_v56 = vpop.f32.mrf.mxu2  ;;  %v776_v58 = vpop.f32.mrf.mxu3 }
 0x11a   :  { %v674_v59 = vpop.f32.mrf.mxu0  ;;  %v709_v60 = vpop.f32.mrf.mxu1 }
 0x11b   :  { %2701 = vmatmul.msk.f32.vlgmr.msrb.gmra.mxu1 %vm931_vm1, %v3414_v2  ;;  %2709 = vmatmul.msk.f32.vlgmr.msrb.gmra.mxu3 %vm931_vm1, %v3416_v3 }
 0x11c   :  { %1861 = vmatpush.msra.mxu0 %v674_v59  ;;  %1907 = vmatpush.msra.mxu2 %v709_v60 }
 0x11e   :  { %1862 = vmatpush.msra.mxu0 %v671_v54  ;;  %1908 = vmatpush.msra.mxu2 %v706_v55 }
 0x120   :  { %1863 = vmatpush.msra.mxu0 %v668_v50  ;;  %1909 = vmatpush.msra.mxu2 %v703_v51 }
 0x121   :  { %v744_v61 = vpop.f32.mrf.mxu2  ;;  %v779_v62 = vpop.f32.mrf.mxu3 }
 0x122   :  { %1953 = vmatpush.msrb.mxu0 %v744_v61  ;;  %v677_v0 = vpop.f32.mrf.mxu0  ;;  %v712_v1 = vpop.f32.mrf.mxu1  ;;  %1999 = vmatpush.msrb.mxu2 %v779_v62 }
 0x124   :  { %1954 = vmatpush.msrb.mxu0 %v741_v56  ;;  %2000 = vmatpush.msrb.mxu2 %v776_v58 }
 0x126   :  { %1955 = vmatpush.msrb.mxu0 %v738_v52  ;;  %2001 = vmatpush.msrb.mxu2 %v773_v53 }
 0x129   :  { %v747_v2 = vpop.f32.mrf.mxu2  ;;  %v782_v3 = vpop.f32.mrf.mxu3 }
 0x12a   :  { %v680_v5 = vpop.f32.mrf.mxu0  ;;  %v715_v6 = vpop.f32.mrf.mxu1 }
 0x131   :  { %v750_v7 = vpop.f32.mrf.mxu2  ;;  %v785_v8 = vpop.f32.mrf.mxu3 }
 0x132   :  { %v683_v9 = vpop.f32.mrf.mxu0  ;;  %v718_v10 = vpop.f32.mrf.mxu1 }
 0x133   :  { %1884 = vmatpush.msra.mxu1 %v683_v9  ;;  %1930 = vmatpush.msra.mxu3 %v718_v10 }
 0x135   :  { %1885 = vmatpush.msra.mxu1 %v680_v5  ;;  %1931 = vmatpush.msra.mxu3 %v715_v6 }
 0x137   :  { %1886 = vmatpush.msra.mxu1 %v677_v0  ;;  %1932 = vmatpush.msra.mxu3 %v712_v1 }
 0x139   :  { %v753_v11 = vpop.f32.mrf.mxu2  ;;  %v788_v13 = vpop.f32.mrf.mxu3 }
 0x13a   :  { %1976 = vmatpush.msrb.mxu1 %v753_v11  ;;  %v3562_v15 = vpop.f32.mrf.mxu0  ;;  %v3564_v16 = vpop.f32.mrf.mxu1  ;;  %2022 = vmatpush.msrb.mxu3 %v788_v13 }
 0x13c   :  { %1977 = vmatpush.msrb.mxu1 %v750_v7  ;;  %2023 = vmatpush.msrb.mxu3 %v785_v8 }
 0x13e   :  { %1978 = vmatpush.msrb.mxu1 %v747_v2  ;;  %2024 = vmatpush.msrb.mxu3 %v782_v3 }
 0x141   :  { %v3566_v18 = vpop.f32.mrf.mxu2  ;;  %v3568_v19 = vpop.f32.mrf.mxu3 }
 0x142   :  { %v3570_v20 = vpop.f32.mrf.mxu0  ;;  %v3572_v21 = vpop.f32.mrf.mxu1 }
 0x149   :  { %v3574_v57 = vpop.f32.mrf.mxu2  ;;  %v3576_v22 = vpop.f32.mrf.mxu3 }
 0x14a   :  { %v3578_v23 = vpop.f32.mrf.mxu0  ;;  %v3580_v24 = vpop.f32.mrf.mxu1 }
 0x151   :  { %v3582_v63 = vpop.f32.mrf.mxu2  ;;  %v3584_v25 = vpop.f32.mrf.mxu3 }
 0x152   :  { %v3586_v26 = vpop.f32.mrf.mxu0  ;;  %v3588_v27 = vpop.f32.mrf.mxu1 }
 0x159   :  { %v3590_v4 = vpop.f32.mrf.mxu2  ;;  %v3592_v28 = vpop.f32.mrf.mxu3 }
 0x15a   :  { %v3594_v29 = vpop.f32.mrf.mxu0  ;;  %v3596_v30 = vpop.f32.mrf.mxu1 }
 0x161   :  { %v3598_v12 = vpop.f32.mrf.mxu2  ;;  %v3600_v31 = vpop.f32.mrf.mxu3 }
 0x162   :  { %v3602_v32 = vpop.f32.mrf.mxu0  ;;  %v3604_v33 = vpop.f32.mrf.mxu1 }
 0x169   :  { %v3606_v14 = vpop.f32.mrf.mxu2  ;;  %v3608_v34 = vpop.f32.mrf.mxu3 }
 0x16a   :  { %v961_v35 = vpop.f32.mrf.mxu0  ;;  %v993_v36 = vpop.f32.mrf.mxu1 }
 0x16b   :  { %v3610_v17 = vmul.f32 0.5, %v993_v36  ;;  %v3626_v48 = vmul.f32 0.5, %v961_v35 }
 0x16d   :  { %v1464_v37 = vsel %vm1460_vm2, %v3610_v17, -inf  ;;  %v1461_v53 = vsel %vm1460_vm2, %v3626_v48, -inf }
 0x16e   :  { %1465 = vmax.xlane.f32.xlu2 %v1464_v37 }
 0x171   :  { %v1025_v40 = vpop.f32.mrf.mxu2  ;;  %v1057_v41 = vpop.f32.mrf.mxu3 }
 0x172   :  { %v3614_v38 = vmul.f32 0.5, %v1025_v40  ;;  %v3616_v39 = vmul.f32 0.5, %v1057_v41  ;;  %v1089_v42 = vpop.f32.mrf.mxu0  ;;  %v1121_v47 = vpop.f32.mrf.mxu1 }
 0x173   :  { %v3618_v44 = vmul.f32 0.5, %v1089_v42  ;;  %v3628_v49 = vmul.f32 0.5, %v1121_v47 }
 0x174   :  { %v1467_v43 = vsel %vm1460_vm2, %v3614_v38, -inf  ;;  %v1470_v45 = vsel %vm1460_vm2, %v3616_v39, -inf }
 0x175   :  { %1468 = vmax.xlane.f32.xlu0 %v1467_v43  ;;  %1471 = vmax.xlane.f32.xlu1 %v1470_v45  ;;  %v1473_v46 = vsel %vm1460_vm2, %v3618_v44, -inf  ;;  %v1476_v55 = vsel %vm1460_vm2, %v3628_v49, -inf }
 0x176   :  { %1474 = vmax.xlane.f32.xlu2 %v1473_v46 }
 0x179   :  { %v1153_v50 = vpop.f32.mrf.mxu2  ;;  %v1185_v54 = vpop.f32.mrf.mxu3 }
 0x17a   :  { %v1450_v51 = vmul.f32 0.5, %v1153_v50  ;;  %v3635_v56 = vmul.f32 0.5, %v1185_v54  ;;  %v1217_v62 = vpop.f32.mrf.mxu0 }
 0x17b   :  { %v3643_v0 = vmul.f32 0.5, %v1217_v62 }
 0x17c   :  { %v1479_v52 = vsel %vm1460_vm2, %v1450_v51, -inf  ;;  %v1482_v61 = vsel %vm1460_vm2, %v3635_v56, -inf }
 0x17d   :  { %1480 = vmax.xlane.f32.xlu1 %v1479_v52  ;;  %1462 = vmax.xlane.f32.xlu0 %v1461_v53  ;;  %v1485_v6 = vsel %vm1460_vm2, %v3643_v0, -inf }
 0x17e   :  { %1477 = vmax.xlane.f32.xlu2 %v1476_v55 }
 0x181   :  { %v1281_v58 = vpop.f32.mrf.mxu2 }
 0x182   :  { %v3637_v59 = vmul.f32 0.5, %v1281_v58 }
 0x183   :  { %v1345_v13 = vpop.f32.mrf.mxu0 }
 0x184   :  { %v1491_v60 = vsel %vm1460_vm2, %v3637_v59, -inf  ;;  %v3659_v36 = vmul.f32 0.5, %v1345_v13 }
 0x185   :  { %1492 = vmax.xlane.f32.xlu1 %v1491_v60  ;;  %1483 = vmax.xlane.f32.xlu0 %v1482_v61 }
 0x186   :  { %v1497_v43 = vsel %vm1460_vm2, %v3659_v36, -inf }
 0x189   :  { %v1409_v1 = vpop.f32.mrf.mxu2 }
 0x18a   :  { %v3645_v2 = vmul.f32 0.5, %v1409_v1 }
 0x18c   :  { %v1249_v3 = vpop.f32.mrf.mxu1  ;;  %v1503_v5 = vsel %vm1460_vm2, %v3645_v2, -inf }
 0x18d   :  { %1504 = vmax.xlane.f32.xlu2 %v1503_v5  ;;  %1486 = vmax.xlane.f32.xlu0 %v1485_v6  ;;  %v3651_v7 = vmul.f32 0.5, %v1249_v3 }
 0x18f   :  { %v1488_v10 = vsel %vm1460_vm2, %v3651_v7, -inf }
 0x192   :  { %v1313_v8 = vpop.f32.mrf.mxu3 }
 0x193   :  { %v3653_v9 = vmul.f32 0.5, %v1313_v8 }
 0x195   :  { %v1494_v11 = vsel %vm1460_vm2, %v3653_v9, -inf  ;;  %1489 = vmax.xlane.f32.xlu0 %v1488_v10 }
 0x196   :  { %1495 = vmax.xlane.f32.xlu1 %v1494_v11 }
 0x198   :  { %v1377_v35 = vpop.f32.mrf.mxu1 }
 0x199   :  { %v3661_v37 = vmul.f32 0.5, %v1377_v35 }
 0x19b   :  { %v1500_v42 = vsel %vm1460_vm2, %v3661_v37, -inf }
 0x19d   :  { %1501 = vmax.xlane.f32.xlu0 %v1500_v42 }
 0x19e   :  { %v1441_v40 = vpop.f32.mrf.mxu3  ;;  %1498 = vmax.xlane.f32.xlu1 %v1497_v43 }
 0x19f   :  { %v3663_v41 = vmul.f32 0.5, %v1441_v40 }
 0x1a1   :  { %v1506_v45 = vsel %vm1460_vm2, %v3663_v41, -inf }
 0x1a2   :  { %1507 = vmax.xlane.f32.xlu2 %v1506_v45 }
 0x1e1   :  { %v1466_v46 = vpop.xlane.xlu2 %1465 }
 0x1e8   :  { %v1469_v47 = vpop.xlane.xlu0 %1468  ;;  %v1472_v50 = vpop.xlane.xlu1 %1471 }
 0x1e9   :  { %v1511_v52 = vsub.f32 %v3614_v38, %v1469_v47  ;;  %v1512_v53 = vsub.f32 %v3616_v39, %v1472_v50  ;;  %v1475_v54 = vpop.xlane.xlu2 %1474  ;;  %v1510_v38 = vsub.f32 %v3610_v17, %v1466_v46 }
 0x1ea   :  { %v1513_v60 = vsub.f32 %v3618_v44, %v1475_v54 }
 0x1eb   :  { %v1529_v55 = vmul.f32 1.442695, %v1511_v52  ;;  %v1531_v58 = vmul.f32 1.442695, %v1512_v53 }
 0x1ec   :  { %v1533_v61 = vmul.f32 1.442695, %v1513_v60 }
 0x1ed   :  { %2754 = vpow2.f32 %v1529_v55 }
 0x1ee   :  { %2756 = vpow2.f32 %v1531_v58 }
 0x1ef   :  { %2758 = vpow2.f32 %v1533_v61 }
 0x1f0   :  { %v1481_v62 = vpop.xlane.xlu1 %1480  ;;  %v1463_v1 = vpop.xlane.xlu0 %1462 }
 0x1f1   :  { %v1515_v3 = vsub.f32 %v1450_v51, %v1481_v62  ;;  %v1509_v5 = vsub.f32 %v3626_v48, %v1463_v1  ;;  %v1478_v6 = vpop.xlane.xlu2 %1477  ;;  %v1527_v48 = vmul.f32 1.442695, %v1510_v38 }
 0x1f2   :  { %v1514_v44 = vsub.f32 %v3628_v49, %v1478_v6 }
 0x1f3   :  { %v3675_v8 = vpop.eup %2754  ;;  %v1537_v10 = vmul.f32 1.442695, %v1515_v3  ;;  %v1525_v39 = vmul.f32 1.442695, %v1509_v5 }
 0x1f4   :  { %v3678_v11 = vpop.eup %2756  ;;  %v1563_v13 = vsel %vm1460_vm2, %v3675_v8, 0.0  ;;  %v1535_v35 = vmul.f32 1.442695, %v1514_v44 }
 0x1f5   :  { %2760 = vpow2.f32 %v1537_v10  ;;  %v1566_v51 = vsel %vm1460_vm2, %v3678_v11, 0.0  ;;  %1564 = vadd.xlane.f32.xlu1 %v1563_v13  ;;  %v3686_v43 = vpop.eup %2758 }
 0x1f6   :  { %2762 = vpow2.f32 %v1525_v39  ;;  %1567 = vadd.xlane.f32.xlu0 %v1566_v51 }
 0x1f7   :  { %2764 = vpow2.f32 %v1527_v48 }
 0x1f8   :  { %v1484_v17 = vpop.xlane.xlu0 %1483  ;;  %v1493_v40 = vpop.xlane.xlu1 %1492  ;;  %2766 = vpow2.f32 %v1535_v35 }
 0x1f9   :  { %v1516_v42 = vsub.f32 %v3635_v56, %v1484_v17  ;;  %v1519_v47 = vsub.f32 %v3637_v59, %v1493_v40  ;;  %v1569_v56 = vsel %vm1460_vm2, %v3686_v43, 0.0 }
 0x1fb   :  { %v3688_v45 = vpop.eup %2760  ;;  %v1539_v49 = vmul.f32 1.442695, %v1516_v42  ;;  %v1545_v53 = vmul.f32 1.442695, %v1519_v47 }
 0x1fc   :  { %v3690_v46 = vpop.eup %2762  ;;  %v1575_v50 = vsel %vm1460_vm2, %v3688_v45, 0.0 }
 0x1fd   :  { %v1557_v52 = vsel %vm1460_vm2, %v3690_v46, 0.0  ;;  %1576 = vadd.xlane.f32.xlu1 %v1575_v50  ;;  %2768 = vpow2.f32 %v1539_v49  ;;  %v3699_v58 = vpop.eup %2764 }
 0x1fe   :  { %1558 = vadd.xlane.f32.xlu2 %v1557_v52  ;;  %1570 = vadd.xlane.f32.xlu0 %v1569_v56  ;;  %v3703_v61 = vpop.eup %2766  ;;  %2770 = vpow2.f32 %v1545_v53  ;;  %v1560_v5 = vsel %vm1460_vm2, %v3699_v58, 0.0 }
 0x1ff   :  { %v1572_v6 = vsel %vm1460_vm2, %v3703_v61, 0.0 }
 0x200   :  { %v1505_v54 = vpop.xlane.xlu2 %1504  ;;  %v1487_v55 = vpop.xlane.xlu0 %1486 }
 0x201   :  { %v1523_v59 = vsub.f32 %v3645_v2, %v1505_v54  ;;  %v1517_v60 = vsub.f32 %v3643_v0, %v1487_v55 }
 0x203   :  { %v1553_v62 = vmul.f32 1.442695, %v1523_v59  ;;  %v1541_v1 = vmul.f32 1.442695, %v1517_v60  ;;  %v3705_v3 = vpop.eup %2768 }
 0x204   :  { %v1578_v38 = vsel %vm1460_vm2, %v3705_v3, 0.0  ;;  %v3715_v44 = vpop.eup %2770 }
 0x205   :  { %2772 = vpow2.f32 %v1553_v62  ;;  %1579 = vadd.xlane.f32.xlu1 %v1578_v38  ;;  %v1587_v40 = vsel %vm1460_vm2, %v3715_v44, 0.0 }
 0x206   :  { %2774 = vpow2.f32 %v1541_v1  ;;  %1561 = vadd.xlane.f32.xlu2 %v1560_v5  ;;  %1573 = vadd.xlane.f32.xlu0 %v1572_v6 }
 0x208   :  { %v1490_v0 = vpop.xlane.xlu0 %1489 }
 0x209   :  { %v1496_v2 = vpop.xlane.xlu1 %1495  ;;  %v1518_v10 = vsub.f32 %v3651_v7, %v1490_v0 }
 0x20a   :  { %v1520_v39 = vsub.f32 %v3653_v9, %v1496_v2 }
 0x20b   :  { %v3717_v13 = vpop.eup %2772  ;;  %v1543_v51 = vmul.f32 1.442695, %v1518_v10 }
 0x20c   :  { %v1547_v48 = vmul.f32 1.442695, %v1520_v39  ;;  %v3719_v35 = vpop.eup %2774  ;;  %v1599_v17 = vsel %vm1460_vm2, %v3717_v13, 0.0 }
 0x20d   :  { %2776 = vpow2.f32 %v1543_v51  ;;  %v1581_v7 = vsel %vm1460_vm2, %v3719_v35, 0.0 }
 0x20e   :  { %2778 = vpow2.f32 %v1547_v48  ;;  %1588 = vadd.xlane.f32.xlu2 %v1587_v40  ;;  %1600 = vadd.xlane.f32.xlu0 %v1599_v17 }
 0x20f   :  { %1582 = vadd.xlane.f32.xlu1 %v1581_v7 }
 0x210   :  { %v1502_v9 = vpop.xlane.xlu0 %1501 }
 0x211   :  { %v1499_v42 = vpop.xlane.xlu1 %1498  ;;  %v1522_v49 = vsub.f32 %v3661_v37, %v1502_v9 }
 0x212   :  { %v1521_v47 = vsub.f32 %v3659_v36, %v1499_v42 }
 0x213   :  { %v3730_v56 = vpop.eup %2776  ;;  %v1551_v53 = vmul.f32 1.442695, %v1522_v49 }
 0x214   :  { %v1549_v54 = vmul.f32 1.442695, %v1521_v47  ;;  %v3732_v55 = vpop.eup %2778  ;;  %v1584_v60 = vsel %vm1460_vm2, %v3730_v56, 0.0 }
 0x215   :  { %v1508_v50 = vpop.xlane.xlu2 %1507  ;;  %2780 = vpow2.f32 %v1551_v53  ;;  %v1590_v62 = vsel %vm1460_vm2, %v3732_v55, 0.0 }
 0x216   :  { %v1524_v52 = vsub.f32 %v3663_v41, %v1508_v50  ;;  %2782 = vpow2.f32 %v1549_v54  ;;  %1591 = vadd.xlane.f32.xlu2 %v1590_v62 }
 0x217   :  { %1585 = vadd.xlane.f32.xlu1 %v1584_v60 }
 0x218   :  { %v1555_v59 = vmul.f32 1.442695, %v1524_v52 }
 0x21a   :  { %2784 = vpow2.f32 %v1555_v59 }
 0x21b   :  { %v3738_v36 = vpop.eup %2780 }
 0x21c   :  { %v3740_v37 = vpop.eup %2782  ;;  %v1596_v41 = vsel %vm1460_vm2, %v3738_v36, 0.0 }
 0x21d   :  { %v1593_v5 = vsel %vm1460_vm2, %v3740_v37, 0.0 }
 0x21e   :  { %1594 = vadd.xlane.f32.xlu2 %v1593_v5 }
 0x21f   :  { %1597 = vadd.xlane.f32.xlu1 %v1596_v41 }
 0x220   :  { %v3744_v1 = vpop.eup %2784 }
 0x221   :  { %v1602_v6 = vsel %vm1460_vm2, %v3744_v1, 0.0 }
 0x222   :  { %1603 = vadd.xlane.f32.xlu0 %v1602_v6 }
 0x268   :  { %v1565_v38 = vpop.xlane.xlu1 %1564 }
 0x269   :  { %v1568_v0 = vpop.xlane.xlu0 %1567  ;;  %2786 = vrcp.f32 %v1565_v38  ;;  %v1642_v9 = vand.u32 2147483647, %v1565_v38  ;;  %v1644_v47 = vand.u32 2147483648, %v1565_v38  ;;  %vm1638_vm6 = vweird.f32 %v1565_v38 }
 0x26a   :  { %2788 = vrcp.f32 %v1568_v0  ;;  %v1656_v49 = vand.u32 2147483647, %v1568_v0  ;;  %v1658_v50 = vand.u32 2147483648, %v1568_v0  ;;  %vm1652_vm5 = vweird.f32 %v1568_v0 }
 0x26b   :  { %vm1643_vm9 = vcmp.eq.f32.partialorder %v1642_v9, 8.507059e+37  ;;  %v1645_v41 = vor.u32 1.1754944e-38, %v1644_v47 }
 0x26c   :  { %vm3761_vm7 = vcmp.eq.f32.partialorder %v1656_v49, 8.507059e+37  ;;  %v1659_v6 = vor.u32 1.1754944e-38, %v1658_v50 }
 0x26f   :  { %v2787_v2 = vpop.eup %2786 }
 0x270   :  { %v2789_v10 = vpop.eup %2788  ;;  %v1634_v39 = vmul.f32 %v2787_v2, %v1565_v38  ;;  %v3750_v51 = vpop.xlane.xlu1 %1576  ;;  %vm1639_vm3 = vweird.f32 %v2787_v2 }
 0x271   :  { %v1648_v48 = vmul.f32 %v2789_v10, %v1568_v0  ;;  %v3752_v17 = vpop.xlane.xlu2 %1558  ;;  %v3754_v40 = vpop.xlane.xlu0 %1570  ;;  %2790 = vrcp.f32 %v3750_v51  ;;  %vm1653_vm4 = vweird.f32 %v2789_v10  ;;  %vm1640_vm8 = vmor %vm1638_vm6, %vm1639_vm3  ;;  %vm1694_vm11 = vweird.f32 %v3750_v51 }
 0x272   :  { %v1635_v7 = vsub.f32 1.0, %v1634_v39  ;;  %2792 = vrcp.f32 %v3752_v17  ;;  %vm1654_vm10 = vmor %vm1652_vm5, %vm1653_vm4  ;;  %v1614_v49 = vand.u32 2147483647, %v3752_v17  ;;  %v1616_v47 = vand.u32 2147483648, %v3752_v17 }
 0x273   :  { %v1649_v42 = vsub.f32 1.0, %v1648_v48  ;;  %2794 = vrcp.f32 %v3754_v40  ;;  %v1700_v62 = vand.u32 2147483648, %v3750_v51  ;;  %vm1610_vm14 = vweird.f32 %v3752_v17 }
 0x274   :  { %v1636_v52 = vmul.f32 %v2787_v2, %v1635_v7  ;;  %vm3795_vm15 = vcmp.eq.f32.partialorder %v1614_v49, 8.507059e+37 }
 0x275   :  { %v1650_v53 = vmul.f32 %v2789_v10, %v1649_v42  ;;  %v1701_v49 = vor.u32 1.1754944e-38, %v1700_v62 }
 0x276   :  { %v1637_v54 = vadd.f32 %v2787_v2, %v1636_v52 }
 0x277   :  { %v3759_v59 = vpop.eup %2790  ;;  %v1651_v60 = vadd.f32 %v2789_v10, %v1650_v53 }
 0x278   :  { %v2793_v5 = vpop.eup %2792  ;;  %v1641_v39 = vsel %vm1640_vm8, %v2787_v2, %v1637_v54  ;;  %v1690_v48 = vmul.f32 %v3759_v59, %v3750_v51  ;;  %vm1695_vm12 = vweird.f32 %v3759_v59 }
 0x279   :  { %v3768_v38 = vpop.eup %2794  ;;  %v1655_v0 = vsel %vm1654_vm10, %v2789_v10, %v1651_v60  ;;  %v1646_v7 = vsel %vm1643_vm9, %v1645_v41, %v1641_v39  ;;  %v1606_v42 = vmul.f32 %v2793_v5, %v3752_v17  ;;  %v3772_v52 = vpop.xlane.xlu2 %1561  ;;  %vm1611_vm13 = vweird.f32 %v2793_v5  ;;  %vm3808_vm3 = vmor %vm1694_vm11, %vm1695_vm12 }
 0x27a   :  { %v1660_v9 = vsel %vm3761_vm7, %v1659_v6, %v1655_v0  ;;  %v1831_v2 = vmul.f32 %v3675_v8, %v1646_v7  ;;  %v1662_v50 = vmul.f32 %v3768_v38, %v3754_v40  ;;  %v3780_v53 = vpop.xlane.xlu0 %1573  ;;  %v3782_v10 = vpop.xlane.xlu1 %1579  ;;  %v1691_v41 = vsub.f32 1.0, %v1690_v48  ;;  %vm1612_vm4 = vmor %vm1610_vm14, %vm1611_vm13 }
 0x27b   :  { %v1832_v54 = vmul.f32 %v3678_v11, %v1660_v9  ;;  %v1607_v60 = vsub.f32 1.0, %v1606_v42  ;;  %2796 = vrcp.f32 %v3772_v52  ;;  %v1698_v8 = vand.u32 2147483647, %v3750_v51 }
 0x27c   :  { %v1663_v39 = vsub.f32 1.0, %v1662_v50  ;;  %2712 = vmatmul.msk.f32.vlgmr.msra.gmra.mxu2 %vm1460_vm2, %v1831_v2  ;;  %v1692_v0 = vmul.f32 %v3759_v59, %v1691_v41  ;;  %2798 = vrcp.f32 %v3780_v53  ;;  %v1670_v7 = vand.u32 2147483647, %v3754_v40 }
 0x27d   :  { %v1608_v6 = vmul.f32 %v2793_v5, %v1607_v60  ;;  %2713 = vmatmul.msk.f32.vlgmr.msra.gmra.mxu3 %vm1460_vm2, %v1832_v54  ;;  %2091 = vmatpush.msra.mxu2 %v3580_v24  ;;  %v1672_v9 = vand.u32 2147483648, %v3754_v40  ;;  %2800 = vrcp.f32 %v3782_v10  ;;  %vm1667_vm5 = vweird.f32 %v3768_v38 }
 0x27e   :  { %v1664_v48 = vmul.f32 %v3768_v38, %v1663_v39  ;;  %2114 = vmatpush.msra.mxu3 %v3604_v33  ;;  %v1693_v2 = vadd.f32 %v3759_v59, %v1692_v0  ;;  %v1617_v33 = vor.u32 1.1754944e-38, %v1616_v47  ;;  %vm1699_vm6 = vcmp.eq.f32.partialorder %v1698_v8, 8.507059e+37 }
 0x27f   :  { %v1609_v42 = vadd.f32 %v2793_v5, %v1608_v6  ;;  %2092 = vmatpush.msra.mxu2 %v3572_v21  ;;  %v1628_v21 = vand.u32 2147483647, %v3772_v52  ;;  %vm1666_vm7 = vweird.f32 %v3754_v40  ;;  %vm3844_vm9 = vcmp.eq.f32.partialorder %v1670_v7, 8.507059e+37 }
 0x280   :  { %v1665_v17 = vadd.f32 %v3768_v38, %v1664_v48  ;;  %2115 = vmatpush.msra.mxu3 %v3596_v30  ;;  %v1697_v54 = vsel %vm3808_vm3, %v3759_v59, %v1693_v2  ;;  %vm3840_vm8 = vmor %vm1666_vm7, %vm1667_vm5  ;;  %v1673_v6 = vor.u32 1.1754944e-38, %v1672_v9  ;;  %vm1624_vm10 = vweird.f32 %v3772_v52 }
 0x281   :  { %v3818_v50 = vpop.eup %2796  ;;  %v1613_v51 = vsel %vm1612_vm4, %v2793_v5, %v1609_v42  ;;  %2093 = vmatpush.msra.mxu2 %v3564_v16  ;;  %v1702_v60 = vsel %vm1699_vm6, %v1701_v49, %v1697_v54  ;;  %v3830_v41 = vpop.xlane.xlu2 %1588  ;;  %vm3860_vm11 = vcmp.eq.f32.partialorder %v1628_v21, 8.507059e+37  ;;  %vm1680_vm12 = vweird.f32 %v3780_v53 }
 0x282   :  { %v1618_v47 = vsel %vm3795_vm15, %v1617_v33, %v1613_v51  ;;  %v1620_v30 = vmul.f32 %v3818_v50, %v3772_v52  ;;  %2116 = vmatpush.msra.mxu3 %v3588_v27  ;;  %v3833_v5 = vpop.xlane.xlu1 %1582  ;;  %v3835_v59 = vpop.eup %2798  ;;  %v1835_v8 = vmul.f32 %v3688_v45, %v1702_v60  ;;  %v1630_v27 = vand.u32 2147483648, %v3772_v52 }
 0x283   :  { %v1829_v39 = vmul.f32 %v3690_v46, %v1618_v47  ;;  %v1669_v62 = vsel %vm3840_vm8, %v3768_v38, %v1665_v17  ;;  %v1676_v0 = vmul.f32 %v3835_v59, %v3780_v53  ;;  %v3855_v11 = vpop.xlane.xlu0 %1600  ;;  %v3857_v48 = vpop.eup %2800  ;;  %2802 = vrcp.f32 %v3830_v41 }
 0x284   :  { %v1621_v46 = vsub.f32 1.0, %v1620_v30  ;;  %2716 = vmatmul.msk.f32.vlgmr.msrb.gmra.mxu2 %vm1460_vm2, %v1835_v8  ;;  %vm1625_vm13 = vweird.f32 %v3818_v50  ;;  %v1704_v42 = vmul.f32 %v3857_v48, %v3782_v10  ;;  %v1674_v9 = vsel %vm3844_vm9, %v1673_v6, %v1669_v62 }
 0x285   :  { %2710 = vmatmul.msk.f32.vlgmr.msra.gmra.mxu0 %vm1460_vm2, %v1829_v39  ;;  %v1677_v38 = vsub.f32 1.0, %v1676_v0  ;;  %2183 = vmatpush.msrb.mxu2 %v3584_v25  ;;  %v1631_v2 = vor.u32 1.1754944e-38, %v1630_v27  ;;  %v1684_v24 = vand.u32 2147483647, %v3780_v53  ;;  %2804 = vrcp.f32 %v3855_v11  ;;  %vm1626_vm15 = vmor %vm1624_vm10, %vm1625_vm13 }
 0x286   :  { %v1622_v45 = vmul.f32 %v3818_v50, %v1621_v46  ;;  %2045 = vmatpush.msra.mxu0 %v3578_v23  ;;  %vm1681_vm14 = vweird.f32 %v3835_v59  ;;  %v1705_v49 = vsub.f32 1.0, %v1704_v42  ;;  %v1686_v23 = vand.u32 2147483648, %v3780_v53 }
 0x287   :  { %v1678_v17 = vmul.f32 %v3835_v59, %v1677_v38  ;;  %2184 = vmatpush.msrb.mxu2 %v3576_v22  ;;  %v1712_v25 = vand.u32 2147483647, %v3782_v10  ;;  %v1714_v51 = vand.u32 2147483648, %v3782_v10  ;;  %2806 = vrcp.f32 %v3833_v5  ;;  %vm3906_vm4 = vmor %vm1680_vm12, %vm1681_vm14 }
 0x288   :  { %v1623_v33 = vadd.f32 %v3818_v50, %v1622_v45  ;;  %2046 = vmatpush.msra.mxu0 %v3570_v20  ;;  %v1706_v20 = vmul.f32 %v3857_v48, %v1705_v49  ;;  %vm1709_vm3 = vweird.f32 %v3857_v48  ;;  %v1833_v47 = vmul.f32 %v3686_v43, %v1674_v9 }
 0x289   :  { %v1679_v21 = vadd.f32 %v3835_v59, %v1678_v17  ;;  %2185 = vmatpush.msrb.mxu2 %v3568_v19  ;;  %v2803_v52 = vpop.eup %2802  ;;  %vm3910_vm5 = vcmp.eq.f32.partialorder %v1684_v24, 8.507059e+37  ;;  %vm1708_vm6 = vweird.f32 %v3782_v10  ;;  %v1687_v16 = vor.u32 1.1754944e-38, %v1686_v23 }
 0x28a   :  { %v1627_v54 = vsel %vm1626_vm15, %v3818_v50, %v1623_v33  ;;  %2047 = vmatpush.msra.mxu0 %v3562_v15  ;;  %v3897_v22 = vpop.xlane.xlu1 %1585  ;;  %v1707_v30 = vadd.f32 %v3857_v48, %v1706_v20  ;;  %v1746_v53 = vmul.f32 %v2803_v52, %v3830_v41  ;;  %vm1710_vm7 = vmor %vm1708_vm6, %vm1709_vm3  ;;  %v1715_v40 = vor.u32 1.1754944e-38, %v1714_v51 }
 0x28b   :  { %v1632_v60 = vsel %vm3860_vm11, %v1631_v2, %v1627_v54  ;;  %v1683_v43 = vsel %vm3906_vm4, %v3835_v59, %v1679_v21  ;;  %v3921_v39 = vpop.eup %2804  ;;  %v1754_v8 = vand.u32 2147483647, %v3830_v41  ;;  %v1756_v10 = vand.u32 2147483648, %v3830_v41 }
 0x28c   :  { %v1830_v19 = vmul.f32 %v3699_v58, %v1632_v60  ;;  %v3927_v58 = vpop.xlane.xlu2 %1591  ;;  %v1711_v59 = vsel %vm1710_vm7, %v3857_v48, %v1707_v30  ;;  %vm1713_vm8 = vcmp.eq.f32.partialorder %v1712_v25, 8.507059e+37  ;;  %v1747_v27 = vsub.f32 1.0, %v1746_v53 }
 0x28d   :  { %2714 = vmatmul.msk.f32.vlgmr.msrb.gmra.mxu0 %vm1460_vm2, %v1833_v47  ;;  %v1802_v62 = vmul.f32 %v3921_v39, %v3855_v11  ;;  %v2807_v6 = vpop.eup %2806  ;;  %v1688_v46 = vsel %vm3910_vm5, %v1687_v16, %v1683_v43  ;;  %v1716_v0 = vsel %vm1713_vm8, %v1715_v40, %v1711_v59  ;;  %vm1751_vm9 = vweird.f32 %v2803_v52 }
 0x28e   :  { %2711 = vmatmul.msk.f32.vlgmr.msra.gmra.mxu1 %vm1460_vm2, %v1830_v19  ;;  %2137 = vmatpush.msrb.mxu0 %v3582_v63  ;;  %2808 = vrcp.f32 %v3897_v22  ;;  %v1836_v48 = vmul.f32 %v3705_v3, %v1716_v0  ;;  %v1748_v7 = vmul.f32 %v2803_v52, %v1747_v27  ;;  %v1718_v38 = vmul.f32 %v2807_v6, %v3833_v5 }
 0x28f   :  { %2068 = vmatpush.msra.mxu1 %v3602_v32  ;;  %v1803_v45 = vsub.f32 1.0, %v1802_v62  ;;  %vm1750_vm10 = vweird.f32 %v3830_v41  ;;  %vm3943_vm11 = vcmp.eq.f32.partialorder %v1754_v8, 8.507059e+37  ;;  %v1757_v42 = vor.u32 1.1754944e-38, %v1756_v10 }
 0x290   :  { %2138 = vmatpush.msrb.mxu0 %v3574_v57  ;;  %v1810_v9 = vand.u32 2147483647, %v3855_v11  ;;  %v1749_v32 = vadd.f32 %v2803_v52, %v1748_v7  ;;  %v1719_v2 = vsub.f32 1.0, %v1718_v38  ;;  %2810 = vrcp.f32 %v3927_v58  ;;  %2717 = vmatmul.msk.f32.vlgmr.msrb.gmra.mxu3 %vm1460_vm2, %v1836_v48  ;;  %vm1752_vm12 = vmor %vm1750_vm10, %vm1751_vm9 }
 0x291   :  { %2069 = vmatpush.msra.mxu1 %v3594_v29  ;;  %v1804_v3 = vmul.f32 %v3921_v39, %v1803_v45  ;;  %v1834_v41 = vmul.f32 %v3703_v61, %v1688_v46  ;;  %vm1807_vm13 = vweird.f32 %v3921_v39  ;;  %v1726_v29 = vand.u32 2147483647, %v3833_v5  ;;  %2206 = vmatpush.msrb.mxu3 %v3608_v34 }
 0x292   :  { %2139 = vmatpush.msrb.mxu0 %v3566_v18  ;;  %v3953_v57 = vpop.xlane.xlu1 %1597  ;;  %v1728_v24 = vand.u32 2147483648, %v3833_v5  ;;  %v1753_v33 = vsel %vm1752_vm12, %v2803_v52, %v1749_v32  ;;  %v1720_v18 = vmul.f32 %v2807_v6, %v1719_v2  ;;  %vm1723_vm14 = vweird.f32 %v2807_v6 }
 0x293   :  { %2070 = vmatpush.msra.mxu1 %v3586_v26  ;;  %v1805_v17 = vadd.f32 %v3921_v39, %v1804_v3  ;;  %v1758_v61 = vsel %vm3943_vm11, %v1757_v42, %v1753_v33  ;;  %vm1806_vm15 = vweird.f32 %v3855_v11  ;;  %v1812_v23 = vand.u32 2147483648, %v3855_v11  ;;  %2207 = vmatpush.msrb.mxu3 %v3600_v31 }
 0x294   :  { %v2809_v49 = vpop.eup %2808  ;;  %2812 = vrcp.f32 %v3953_v57  ;;  %v1839_v34 = vmul.f32 %v3715_v44, %v1758_v61  ;;  %vm3972_vm3 = vmor %vm1806_vm15, %vm1807_vm13  ;;  %v1721_v25 = vadd.f32 %v2807_v6, %v1720_v18  ;;  %vm1722_vm4 = vweird.f32 %v3833_v5  ;;  %v3984_v44 = vpop.xlane.xlu2 %1594 }
 0x295   :  { %v1732_v51 = vmul.f32 %v2809_v49, %v3897_v22  ;;  %vm3979_vm5 = vcmp.eq.f32.partialorder %v1810_v9, 8.507059e+37  ;;  %vm1724_vm6 = vmor %vm1722_vm4, %vm1723_vm14  ;;  %vm1727_vm7 = vcmp.eq.f32.partialorder %v1726_v29, 8.507059e+37  ;;  %v1729_v31 = vor.u32 1.1754944e-38, %v1728_v24  ;;  %2208 = vmatpush.msrb.mxu3 %v3592_v28  ;;  %v3994_v15 = vpop.xlane.xlu0 %1603 }
 0x296   :  { %2715 = vmatmul.msk.f32.vlgmr.msrb.gmra.mxu1 %vm1460_vm2, %v1834_v41  ;;  %v2811_v54 = vpop.eup %2810  ;;  %v1809_v5 = vsel %vm3972_vm3, %v3921_v39, %v1805_v17  ;;  %v1725_v21 = vsel %vm1724_vm6, %v2807_v6, %v1721_v25  ;;  %v1740_v52 = vand.u32 2147483647, %v3897_v22  ;;  %2720 = vmatmul.msk.f32.vlgmr.msra.gmra.mxu2 %vm1460_vm2, %v1839_v34  ;;  %v1813_v47 = vor.u32 1.1754944e-38, %v1812_v23 }
 0x297   :  { %2160 = vmatpush.msrb.mxu1 %v3606_v14  ;;  %v1733_v20 = vsub.f32 1.0, %v1732_v51  ;;  %v1730_v60 = vsel %vm1727_vm7, %v1729_v31, %v1725_v21  ;;  %v1742_v50 = vand.u32 2147483648, %v3897_v22  ;;  %v1760_v28 = vmul.f32 %v2811_v54, %v3927_v58  ;;  %v2218_v21 = vld [vmem:[%s4110_s6 + $0x14] sm:$0xf] }
 0x298   :  { %v1837_v14 = vmul.f32 %v3719_v35, %v1730_v60  ;;  %vm1737_vm8 = vweird.f32 %v2809_v49  ;;  %2814 = vrcp.f32 %v3984_v44  ;;  %v1814_v30 = vsel %vm3979_vm5, %v1813_v47, %v1809_v5  ;;  %v2217_v5 = vld [vmem:[%s4110_s6 + $0x10] sm:$0xf]  ;;  %v2220_v47 = vld [vmem:[%s4110_s6 + $0x1c] sm:$0xf] }
 0x299   :  { %2161 = vmatpush.msrb.mxu1 %v3598_v12  ;;  %v1734_v19 = vmul.f32 %v2809_v49, %v1733_v20  ;;  %vm1736_vm9 = vweird.f32 %v3897_v22  ;;  %v1761_v53 = vsub.f32 1.0, %v1760_v28  ;;  %v1770_v39 = vand.u32 2147483648, %v3927_v58  ;;  %v2219_v28 = vld [vmem:[%s4110_s6 + $0x18] sm:$0xf] }
 0x29a   :  { %v2813_v43 = vpop.eup %2812  ;;  %vm1741_vm10 = vcmp.eq.f32.partialorder %v1740_v52, 8.507059e+37  ;;  %2816 = vrcp.f32 %v3994_v15  ;;  %2718 = vmatmul.msk.f32.vlgmr.msra.gmra.mxu0 %vm1460_vm2, %v1837_v14  ;;  %vm1738_vm11 = vmor %vm1736_vm9, %vm1737_vm8  ;;  %v1743_v35 = vor.u32 1.1754944e-38, %v1742_v50  ;;  %vm1765_vm12 = vweird.f32 %v2811_v54 }
 0x29b   :  { %2162 = vmatpush.msrb.mxu1 %v3590_v4  ;;  %v1735_v16 = vadd.f32 %v2809_v49, %v1734_v19  ;;  %v1788_v12 = vmul.f32 %v2813_v43, %v3953_v57  ;;  %v1762_v40 = vmul.f32 %v2811_v54, %v1761_v53  ;;  %v1768_v8 = vand.u32 2147483647, %v3927_v58 }
 0x29c   :  { %v1843_v22 = vmul.f32 %v3717_v13, %v1814_v30  ;;  %vm1764_vm13 = vweird.f32 %v3927_v58  ;;  %v1771_v62 = vor.u32 1.1754944e-38, %v1770_v39  ;;  %v1798_v6 = vand.u32 2147483648, %v3953_v57 }
 0x29d   :  { %v1739_v10 = vsel %vm1738_vm11, %v2809_v49, %v1735_v16  ;;  %v1789_v4 = vsub.f32 1.0, %v1788_v12  ;;  %v1763_v27 = vadd.f32 %v2811_v54, %v1762_v40  ;;  %vm1766_vm14 = vmor %vm1764_vm13, %vm1765_vm12  ;;  %vm1793_vm15 = vweird.f32 %v2813_v43 }
 0x29e   :  { %v1744_v59 = vsel %vm1741_vm10, %v1743_v35, %v1739_v10  ;;  %v2815_v46 = vpop.eup %2814  ;;  %v1796_v7 = vand.u32 2147483647, %v3953_v57  ;;  %2724 = vmatmul.msk.f32.vlgmr.msrb.gmra.mxu2 %vm1460_vm2, %v1843_v22  ;;  %vm1769_vm3 = vcmp.eq.f32.partialorder %v1768_v8, 8.507059e+37  ;;  %vm1792_vm4 = vweird.f32 %v3953_v57 }
 0x29f   :  { %v1838_v0 = vmul.f32 %v3730_v56, %v1744_v59  ;;  %v1790_v48 = vmul.f32 %v2813_v43, %v1789_v4  ;;  %v1767_v13 = vsel %vm1766_vm14, %v2811_v54, %v1763_v27  ;;  %v1774_v58 = vmul.f32 %v2815_v46, %v3984_v44  ;;  %vm1794_vm5 = vmor %vm1792_vm4, %vm1793_vm15  ;;  %v2215_v54 = vld [vmem:[%s4110_s6 + $0x8] sm:$0xf] }
 0x2a0   :  { %v2817_v45 = vpop.eup %2816  ;;  %v1772_v38 = vsel %vm1769_vm3, %v1771_v62, %v1767_v13  ;;  %v1799_v42 = vor.u32 1.1754944e-38, %v1798_v6  ;;  %vm1797_vm6 = vcmp.eq.f32.partialorder %v1796_v7, 8.507059e+37  ;;  %v1782_v2 = vand.u32 2147483647, %v3984_v44 }
 0x2a1   :  { %v1791_v63 = vadd.f32 %v2813_v43, %v1790_v48  ;;  %2719 = vmatmul.msk.f32.vlgmr.msra.gmra.mxu1 %vm1460_vm2, %v1838_v0  ;;  %v1840_v56 = vmul.f32 %v3732_v55, %v1772_v38  ;;  %v1775_v9 = vsub.f32 1.0, %v1774_v58  ;;  %v1816_v32 = vmul.f32 %v2817_v45, %v3994_v15 }
 0x2a2   :  { %v1784_v41 = vand.u32 2147483648, %v3984_v44  ;;  %vm1779_vm7 = vweird.f32 %v2815_v46  ;;  %vm1778_vm8 = vweird.f32 %v3984_v44  ;;  %v1826_v55 = vand.u32 2147483648, %v3994_v15  ;;  %v2214_v44 = vld [vmem:[%s4110_s6 + $0x4] sm:$0xf] }
 0x2a3   :  { %v1795_v3 = vsel %vm1794_vm5, %v2813_v43, %v1791_v63  ;;  %v1776_v24 = vmul.f32 %v2815_v46, %v1775_v9  ;;  %v1817_v33 = vsub.f32 1.0, %v1816_v32  ;;  %2721 = vmatmul.msk.f32.vlgmr.msra.gmra.mxu3 %vm1460_vm2, %v1840_v56  ;;  %vm1821_vm9 = vweird.f32 %v2817_v45  ;;  %vm1780_vm10 = vmor %vm1778_vm8, %vm1779_vm7 }
 0x2a4   :  { %v1800_v29 = vsel %vm1797_vm6, %v1799_v42, %v1795_v3  ;;  %v1824_v49 = vand.u32 2147483647, %v3994_v15  ;;  %v1785_v61 = vor.u32 1.1754944e-38, %v1784_v41  ;;  %vm1783_vm11 = vcmp.eq.f32.partialorder %v1782_v2, 8.507059e+37 }
 0x2a5   :  { %v1842_v57 = vmul.f32 %v3738_v36, %v1800_v29  ;;  %v1777_v17 = vadd.f32 %v2815_v46, %v1776_v24  ;;  %v1818_v18 = vmul.f32 %v2817_v45, %v1817_v33  ;;  %vm1820_vm12 = vweird.f32 %v3994_v15 }
 0x2a6   :  { %vm1822_vm13 = vmor %vm1820_vm12, %vm1821_vm9  ;;  %v1827_v25 = vor.u32 1.1754944e-38, %v1826_v55  ;;  %vm1825_vm14 = vcmp.eq.f32.partialorder %v1824_v49, 8.507059e+37  ;;  %vm2227_vm15 = vcmask 1043456  }
 0x2a7   :  { %v1781_v23 = vsel %vm1780_vm10, %v2815_v46, %v1777_v17  ;;  %v1819_v34 = vadd.f32 %v2817_v45, %v1818_v18  ;;  %2729 = vmatpush.msk.msra.mxu1 %vm2227_vm15, %v2214_v44  ;;  %2732 = vmatpush.msk.msra.mxu2 %vm2227_vm15, %v2215_v54 }
 0x2a8   :  { %v1786_v26 = vsel %vm1783_vm11, %v1785_v61, %v1781_v23 }
 0x2a9   :  { %2723 = vmatmul.msk.f32.vlgmr.msrb.gmra.mxu1 %vm1460_vm2, %v1842_v57  ;;  %v1841_v36 = vmul.f32 %v3740_v37, %v1786_v26  ;;  %v1823_v51 = vsel %vm1822_vm13, %v2817_v45, %v1819_v34  ;;  %v2213_v37 = vld [vmem:[%s4110_s6] sm:$0xf]  ;;  %2744 = vmatpush.msk.msrb.mxu2 %vm2227_vm15, %v2219_v28 }
 0x2aa   :  { %v1828_v11 = vsel %vm1825_vm14, %v1827_v25, %v1823_v51  ;;  %2726 = vmatpush.msk.msra.mxu0 %vm2227_vm15, %v2213_v37  ;;  %2741 = vmatpush.msk.msrb.mxu1 %vm2227_vm15, %v2218_v21  ;;  %v2753_v26 = vld [vmem:[%s4111_s7] ss:$0 sm:$0xff] }
 0x2ab   :  { %v1844_v31 = vmul.f32 %v3744_v1, %v1828_v11  ;;  %2722 = vmatmul.msk.f32.vlgmr.msrb.gmra.mxu0 %vm1460_vm2, %v1841_v36  ;;  %v2216_v1 = vld [vmem:[%s4110_s6 + $0xc] sm:$0xf] }
 0x2ac   :  { %2735 = vmatpush.msk.msra.mxu3 %vm2227_vm15, %v2216_v1  ;;  %2738 = vmatpush.msk.msrb.mxu0 %vm2227_vm15, %v2217_v5 }
 0x2ad   :  { %2725 = vmatmul.msk.f32.vlgmr.msrb.gmra.mxu3 %vm1460_vm2, %v1844_v31 }
 0x2ae   :  { %2747 = vmatpush.msk.msrb.mxu3 %vm2227_vm15, %v2220_v47 }
 0x2ff   :  { %v1911_v20 = vpop.f32.mrf.mxu2 }
 0x300   :  { %2730 = vmatmul.msk.f32.vlgmr.msra.gmra.mxu1 %vm931_vm1, %v1911_v20  ;;  %v1934_v60 = vpop.f32.mrf.mxu3 }
 0x302   :  { %v1865_v52 = vpop.f32.mrf.mxu0 }
 0x303   :  { %2727 = vmatmul.msk.f32.vlgmr.msra.gmra.mxu0 %vm931_vm1, %v1865_v52 }
 0x307   :  { %v2003_v50 = vpop.f32.mrf.mxu2 }
 0x308   :  { %2731 = vmatmul.msk.f32.gmra.mxu1 %vm931_vm1, %v1934_v60  ;;  %2736 = vmatmul.msk.f32.vlgmr.msra.gmra.mxu3 %vm931_vm1, %v2003_v50 }
 0x30a   :  { %v1957_v15 = vpop.f32.mrf.mxu0 }
 0x30b   :  { %v1888_v14 = vpop.f32.mrf.mxu1  ;;  %2733 = vmatmul.msk.f32.vlgmr.msra.gmra.mxu2 %vm931_vm1, %v1957_v15 }
 0x30c   :  { %2728 = vmatmul.msk.f32.gmra.mxu0 %vm931_vm1, %v1888_v14 }
 0x313   :  { %v1980_v19 = vpop.f32.mrf.mxu1  ;;  %v2026_v43 = vpop.f32.mrf.mxu3 }
 0x314   :  { %2734 = vmatmul.msk.f32.gmra.mxu2 %vm931_vm1, %v1980_v19  ;;  %2737 = vmatmul.msk.f32.gmra.mxu3 %vm931_vm1, %v2026_v43 }
 0x317   :  { %v2049_v30 = vpop.f32.mrf.mxu0 }
 0x318   :  { %2739 = vmatmul.msk.f32.vlgmr.msrb.gmra.mxu0 %vm931_vm1, %v2049_v30 }
 0x319   :  { %v2095_v53 = vpop.f32.mrf.mxu2 }
 0x31a   :  { %2742 = vmatmul.msk.f32.vlgmr.msrb.gmra.mxu1 %vm931_vm1, %v2095_v53 }
 0x31e   :  { %v2072_v39 = vpop.f32.mrf.mxu1 }
 0x320   :  { %2740 = vmatmul.msk.f32.gmra.mxu0 %vm931_vm1, %v2072_v39 }
 0x321   :  { %v2187_v16 = vpop.f32.mrf.mxu2 }
 0x322   :  { %2748 = vmatmul.msk.f32.vlgmr.msrb.gmra.mxu3 %vm931_vm1, %v2187_v16 }
 0x326   :  { %v2118_v12 = vpop.f32.mrf.mxu3  ;;  %v2164_v40 = vpop.f32.mrf.mxu1 }
 0x327   :  { %2743 = vmatmul.msk.f32.gmra.mxu1 %vm931_vm1, %v2118_v12 }
 0x328   :  { %v2141_v35 = vpop.f32.mrf.mxu0 }
 0x329   :  { %2745 = vmatmul.msk.f32.vlgmr.msrb.gmra.mxu2 %vm931_vm1, %v2141_v35 }
 0x330   :  { %v2210_v8 = vpop.f32.mrf.mxu3 }
 0x331   :  { %2749 = vmatmul.msk.f32.gmra.mxu3 %vm931_vm1, %v2210_v8  ;;  %2746 = vmatmul.msk.f32.gmra.mxu2 %vm931_vm1, %v2164_v40 }
 0x37d   :  { %v2280_v10 = vpop.f32.mrf.mxu1 }
 0x37e   :  { %v2479_v46 = vsel %vm80_vm0, %v2280_v10, 0.0 }
 0x380   :  { %v2248_v22 = vpop.f32.mrf.mxu0 }
 0x381   :  { %v2478_v6 = vsel %vm80_vm0, %v2248_v22, 0.0 }
 0x382   :  { %v2480_v48 = vadd.f32 %v2479_v46, %v2478_v6 }
 0x385   :  { %v2283_v62 = vpop.f32.mrf.mxu1 }
 0x386   :  { %v2494_v9 = vsel %vm80_vm0, %v2283_v62, 0.0 }
 0x389   :  { %v2251_v4 = vpop.f32.mrf.mxu0 }
 0x38a   :  { %v2493_v63 = vsel %vm80_vm0, %v2251_v4, 0.0 }
 0x38b   :  { %v2344_v27 = vpop.f32.mrf.mxu3  ;;  %v2495_v3 = vadd.f32 %v2494_v9, %v2493_v63 }
 0x38c   :  { %v2483_v56 = vsel %vm80_vm0, %v2344_v27, 0.0 }
 0x38e   :  { %v2312_v59 = vpop.f32.mrf.mxu2 }
 0x38f   :  { %v2481_v0 = vsel %vm80_vm0, %v2312_v59, 0.0 }
 0x390   :  { %v2482_v7 = vadd.f32 %v2481_v0, %v2480_v48 }
 0x392   :  { %v2484_v42 = vadd.f32 %v2483_v56, %v2482_v7 }
 0x395   :  { %v2376_v13 = vpop.f32.mrf.mxu0 }
 0x396   :  { %v2485_v2 = vsel %vm80_vm0, %v2376_v13, 0.0 }
 0x397   :  { %v2315_v58 = vpop.f32.mrf.mxu2  ;;  %v2347_v45 = vpop.f32.mrf.mxu3  ;;  %v2486_v29 = vadd.f32 %v2485_v2, %v2484_v42 }
 0x398   :  { %v2408_v38 = vpop.f32.mrf.mxu1  ;;  %v2496_v32 = vsel %vm80_vm0, %v2315_v58, 0.0  ;;  %v2498_v17 = vsel %vm80_vm0, %v2347_v45, 0.0 }
 0x399   :  { %v2487_v41 = vsel %vm80_vm0, %v2408_v38, 0.0  ;;  %v2497_v24 = vadd.f32 %v2496_v32, %v2495_v3 }
 0x39a   :  { %v2488_v33 = vadd.f32 %v2487_v41, %v2486_v29 }
 0x39b   :  { %v2499_v61 = vadd.f32 %v2498_v17, %v2497_v24 }
 0x39d   :  { %v2379_v49 = vpop.f32.mrf.mxu0 }
 0x39e   :  { %v2500_v51 = vsel %vm80_vm0, %v2379_v49, 0.0 }
 0x39f   :  { %v2501_v31 = vadd.f32 %v2500_v51, %v2499_v61 }
 0x3a4   :  { %v2411_v23 = vpop.f32.mrf.mxu1 }
 0x3a5   :  { %v2472_v57 = vpop.f32.mrf.mxu3  ;;  %v2502_v11 = vsel %vm80_vm0, %v2411_v23, 0.0 }
 0x3a6   :  { %v2491_v25 = vsel %vm80_vm0, %v2472_v57, 0.0  ;;  %v2503_v37 = vadd.f32 %v2502_v11, %v2501_v31 }
 0x3ac   :  { %v2440_v55 = vpop.f32.mrf.mxu2 }
 0x3ad   :  { %v2489_v18 = vsel %vm80_vm0, %v2440_v55, 0.0 }
 0x3ae   :  { %v2490_v34 = vadd.f32 %v2489_v18, %v2488_v33 }
 0x3b0   :  { %v2492_v36 = vadd.f32 %v2491_v25, %v2490_v34 }
 0x3b2   :  { %v2512_v44 = vadd.f32 %v2753_v26, %v2492_v36 }
 0x3b4   :  { %2514 = vst.msk [vmem:[#allocation2] sm:$0xff] %vm80_vm0, %v2512_v44  ;;  %v2475_v1 = vpop.f32.mrf.mxu3  ;;  %v2443_v54 = vpop.f32.mrf.mxu2 }
 0x3b5   :  { %v2504_v5 = vsel %vm80_vm0, %v2443_v54, 0.0  ;;  %v2506_v20 = vsel %vm80_vm0, %v2475_v1, 0.0 }
 0x3b6   :  { %v2505_v21 = vadd.f32 %v2504_v5, %v2503_v37 }
 0x3b8   :  { %v2507_v52 = vadd.f32 %v2506_v20, %v2505_v21 }
 0x3ba   :  { %v2513_v47 = vadd.f32 %v2753_v26, %v2507_v52 }
 0x3bc   :  { %2515 = vst.msk [vmem:[#allocation2 + $0x8] sm:$0xff] %vm80_vm0, %v2513_v47 }
 0x3bd   :  { %2528 = dma.vmem_to_hbm [thread:$0]  %s2521_s0, 256, %s2523_s10, [#allocation3], %s2845_s11, %s2845_s11, %s2846_s12  }
 0x3be   :  { %2842 = dma.done.wait [#allocation3], 256  }
 0x3bf   :  { %2843 = vsyncadd [#allocation3], 4294967040 }
 0x3c0   :  { %2533 = vsyncpa [#allocation3], 1 }

</bundles_post_ra>
